<compile_context>
chip_gen: v6e
topology: v6e:2x2x1
jax: 0.10.0
libtpu: 0.0.40
codegen_flags: <defaults>
</compile_context>

<pallas_src>
import functools

import jax
import jax.numpy as jnp
from jax.experimental import pallas as pl
from jax.experimental.pallas import tpu as pltpu


def _round_up(x, m):
    return (x + m - 1) // m * m


# Cap on lanes per block so live values (mid bf16 + acc f32 + x bf16) stay well
# inside the 64-vreg file; at S=512 this allows up to 4 images per block.
_MAX_BLOCK_LANES = 2048


def _images_per_block(N, S):
    cap = max(1, _MAX_BLOCK_LANES // S)
    if N <= cap:
        # Everything fits in one block.  For tiny batches (N < 4) step overhead
        # dominates -> fully collapse (wins on v5e/v6e, a wash on v7x).  Once
        # there's enough work, keep >= 2 parallel grid steps for v7x's 2 TCs.
        return N if N < 4 else -(-N // 2)
    g = -(-N // cap)          # groups needed at the cap
    return -(-N // g)         # balance images across groups


def _double_conv_kernel(x_ref, mask_ref, w1_ref, s1_ref, b1_ref,
                        w2_ref, s2_ref, b2_ref, o_ref, *, Wp, S, Q):
    """One group of NB images, channel-major / flattened-spatial, batch in lanes.

    x_ref   : (Cin, NB*S)  image b occupies lanes [b*S, b*S+P): Wp+1 leading zeros,
                           then the zero-padded image flattened with row stride Wp.
    mask_ref: (1, LB)      LB = (NB-1)*S + L; 1.0 on interior lanes of each image's
                           padded conv1-output, 0.0 on padding rings / segment gaps.
    w1_ref  : (9, C1, Cin) conv1 taps (bf16), tap t = kh*3 + kw.
    s1/b1   : (C1, 1)      folded BN1 scale / shift (includes conv1 bias), f32.
    w2_ref  : (9, C2, C1)  conv2 taps (bf16).
    s2/b2   : (C2, 1)      folded BN2 scale / shift, f32.
    o_ref   : (NB, C2, S)  image b's output pixel (h, w) at lane h*Wp + w (< Q).
    """
    NB = o_ref.shape[0]
    C2 = o_ref.shape[1]
    C1 = w1_ref.shape[1]
    LB = mask_ref.shape[1]                 # (NB-1)*S + L intermediate lanes
    QB = (NB - 1) * S + Q                  # carried output lanes
    taps = [kh * Wp + kw for kh in range(3) for kw in range(3)]

    # bf16 MXU inputs; weights are pre-cast in the wrapper, activations cast once.
    x = x_ref[...].astype(jnp.bfloat16)    # (Cin, NB*S)
    w1 = w1_ref[...]                       # (9, C1, Cin) bf16
    w2 = w2_ref[...]                       # (9, C2, C1) bf16

    # ---- conv1: 9 lane-dense tap matmuls over the whole image group ----------
    acc1 = jnp.zeros((C1, LB), jnp.float32)
    for t, off in enumerate(taps):
        acc1 = acc1 + jnp.dot(w1[t], x[:, off:off + LB],
                              preferred_element_type=jnp.float32)

    # ---- folded BN1 + ReLU; zero padding rings / segment gaps ---------------
    y = jnp.maximum(acc1 * s1_ref[...] + b1_ref[...], 0.0)
    mid = (y * mask_ref[...]).astype(jnp.bfloat16)   # (C1, LB), held in registers

    # ---- conv2 ---------------------------------------------------------------
    acc2 = jnp.zeros((C2, QB), jnp.float32)
    for t, off in enumerate(taps):
        acc2 = acc2 + jnp.dot(w2[t], mid[:, off:off + QB],
                              preferred_element_type=jnp.float32)

    # ---- folded BN2 + ReLU; lane-dense per-image stores ----------------------
    z = jnp.maximum(acc2 * s2_ref[...] + b2_ref[...], 0.0).astype(o_ref.dtype)
    for b in range(NB):
        o_ref[b, :, :Q] = z[:, b * S:b * S + Q]
        if S > Q:  # deterministic tail (cropped by the wrapper)
            o_ref[b, :, Q:] = jnp.zeros((C2, S - Q), o_ref.dtype)


def double_conv(x_nchw, params):
    """Forward pass of DoubleConv. x_nchw: (N, Cin, H, W) float32 -> (N, C2, H, W)."""
    (w1, bconv1, g1, be1, rm1, rv1,
     w2, bconv2, g2, be2, rm2, rv2) = params
    eps = 1e-5

    N, Cin, H, W = x_nchw.shape
    C1 = w1.shape[0]
    C2 = w2.shape[0]

    # Fold conv bias + eval-mode BN into per-channel scale/shift:
    #   bn(conv(x) + b) = conv(x)*g/sqrt(rv+eps) + ((b - rm)*g/sqrt(rv+eps) + be)
    inv1 = g1 / jnp.sqrt(rv1 + eps)
    s1 = inv1.reshape(C1, 1)
    b1 = ((bconv1 - rm1) * inv1 + be1).reshape(C1, 1)
    inv2 = g2 / jnp.sqrt(rv2 + eps)
    s2 = inv2.reshape(C2, 1)
    b2 = ((bconv2 - rm2) * inv2 + be2).reshape(C2, 1)

    # PyTorch OIHW -> (tap = kh*3 + kw, out, in), pre-cast to bf16 (grid-invariant).
    w1_k = jnp.transpose(w1, (2, 3, 0, 1)).reshape(9, C1, Cin).astype(jnp.bfloat16)
    w2_k = jnp.transpose(w2, (2, 3, 0, 1)).reshape(9, C2, C1).astype(jnp.bfloat16)

    # ---- channel-major flattened-spatial geometry, batch folded into lanes ----
    Wp = _round_up(W + 2, 8)         # padded row stride
    Q = H * Wp                       # valid output lanes per image
    L = Q + 2 * Wp + 2               # intermediate lanes per image
    P = L + 2 * Wp + 2               # input lanes per image
    S = _round_up(P, 128)            # uniform per-image lane segment

    NB = _images_per_block(N, S)     # images per grid step
    G = -(-N // NB)                  # grid steps
    Npad = G * NB

    # Input: (Cin, Npad*S); image n at lanes [n*S, n*S+P) with Wp+1 leading zeros.
    xt = jnp.transpose(x_nchw, (1, 0, 2, 3))                     # (Cin, N, H, W)
    xt = jnp.pad(xt, ((0, 0), (0, 0), (1, 1), (1, Wp - W - 1)))  # (Cin, N, H+2, Wp)
    xt = xt.reshape(Cin, N, (H + 2) * Wp)
    xt = jnp.pad(xt, ((0, 0), (0, 0), (Wp + 1, S - (H + 2) * Wp - (Wp + 1))))
    xt = jnp.pad(xt, ((0, 0), (0, Npad - N), (0, 0)))            # (Cin, Npad, S)
    xe = xt.reshape(Cin, Npad * S)

    # Interior mask of each image's padded intermediate (zeros on rings and gaps).
    LB = (NB - 1) * S + L
    idx = jnp.arange(LB, dtype=jnp.int32)
    j = idx % S
    prow = j // Wp
    pcol = j % Wp
    mask1 = ((prow >= 1) & (prow <= H) & (pcol >= 1) & (pcol <= W))
    mask1 = mask1.astype(jnp.float32).reshape(1, LB)

    kernel = functools.partial(_double_conv_kernel, Wp=Wp, S=S, Q=Q)

    flops = 2 * N * H * W * 9 * (Cin * C1 + C1 * C2)
    bytes_accessed = (xe.size * 4 + mask1.size * 4 + w1_k.size * 2 + w2_k.size * 2
                      + (s1.size + b1.size + s2.size + b2.size) * 4
                      + Npad * C2 * S * 4)

    out = pl.pallas_call(
        kernel,
        out_shape=jax.ShapeDtypeStruct((Npad, C2, S), x_nchw.dtype),
        grid_spec=pltpu.PrefetchScalarGridSpec(
            num_scalar_prefetch=0,
            grid=(G,),
            in_specs=[
                pl.BlockSpec((Cin, NB * S), lambda g: (0, g)),    # xe (group g)
                pl.BlockSpec((1, LB), lambda g: (0, 0)),          # interior mask
                pl.BlockSpec((9, C1, Cin), lambda g: (0, 0, 0)),  # w1 (bf16)
                pl.BlockSpec((C1, 1), lambda g: (0, 0)),          # s1
                pl.BlockSpec((C1, 1), lambda g: (0, 0)),          # b1
                pl.BlockSpec((9, C2, C1), lambda g: (0, 0, 0)),   # w2 (bf16)
                pl.BlockSpec((C2, 1), lambda g: (0, 0)),          # s2
                pl.BlockSpec((C2, 1), lambda g: (0, 0)),          # b2
            ],
            out_specs=pl.BlockSpec((NB, C2, S), lambda g: (g, 0, 0)),
        ),
        compiler_params=pltpu.CompilerParams(
            dimension_semantics=("parallel",),
            # Blocks total well under 1 MiB; explicit limit leaves headroom on
            # every generation (v7x has only 64 MiB physical VMEM).
            vmem_limit_bytes=16 * 1024 * 1024,
        ),
        cost_estimate=pl.CostEstimate(
            flops=flops, transcendentals=0, bytes_accessed=bytes_accessed),
    )(xe, mask1, w1_k, s1, b1, w2_k, s2, b2)

    # Image n, pixel (h, w) lives at out[n, :, h*Wp + w]; crop is a reshape+slice
    # (no transpose).  At scale, prefer exposing the padded (N, C2, H, Wp) layout
    # to consumers instead of paying this extra output pass.
    return out[:N, :, :Q].reshape(N, C2, H, Wp)[:, :, :, :W]


def double_conv_reference(x, params):
    """Pure-JAX reference (XLA convs, eval-mode BN) for correctness checking."""
    (w1, bconv1, g1, be1, rm1, rv1,
     w2, bconv2, g2, be2, rm2, rv2) = params
    eps = 1e-5

    def block(h, w, b, g, be, rm, rv):
        y = jax.lax.conv_general_dilated(
            h, w, window_strides=(1, 1), padding=((1, 1), (1, 1)),
            dimension_numbers=("NCHW", "OIHW", "NCHW"))
        y = y + b.reshape(1, -1, 1, 1)
        y = (y - rm.reshape(1, -1, 1, 1)) * (
            g.reshape(1, -1, 1, 1) / jnp.sqrt(rv.reshape(1, -1, 1, 1) + eps))
        y = y + be.reshape(1, -1, 1, 1)
        return jnp.maximum(y, 0.0)

    h = block(x, w1, bconv1, g1, be1, rm1, rv1)
    return block(h, w2, bconv2, g2, be2, rm2, rv2)


def init_params(key, in_ch, out_ch):
    """Deterministic parameter init matching nn.Conv2d / nn.BatchNorm2d shapes."""
    k = jax.random.split(key, 4)
    w1 = jax.random.normal(k[0], (out_ch, in_ch, 3, 3), jnp.float32) * 0.1
    bconv1 = jax.random.normal(k[1], (out_ch,), jnp.float32) * 0.1
    w2 = jax.random.normal(k[2], (out_ch, out_ch, 3, 3), jnp.float32) * 0.1
    bconv2 = jax.random.normal(k[3], (out_ch,), jnp.float32) * 0.1
    # BatchNorm2d params / running stats (eval mode)
    g1, be1 = jnp.ones((out_ch,), jnp.float32), jnp.zeros((out_ch,), jnp.float32)
    rm1, rv1 = jnp.zeros((out_ch,), jnp.float32), jnp.ones((out_ch,), jnp.float32)
    g2, be2 = jnp.ones((out_ch,), jnp.float32), jnp.zeros((out_ch,), jnp.float32)
    rm2, rv2 = jnp.zeros((out_ch,), jnp.float32), jnp.ones((out_ch,), jnp.float32)
    return (w1, bconv1, g1, be1, rm1, rv1, w2, bconv2, g2, be2, rm2, rv2)


if __name__ == "__main__":
    key = jax.random.PRNGKey(0)
    kx, kp = jax.random.split(key)

    N, in_ch, out_ch, H, W = 2, 4, 8, 16, 16
    x = jax.random.normal(kx, (N, in_ch, H, W), jnp.float32)
    params = init_params(kp, in_ch, out_ch)

    out = double_conv(x, params)
    jax.block_until_ready(out)

    assert out.shape == (N, out_ch, H, W), out.shape
    assert bool(jnp.all(out >= 0.0)), "ReLU output must be non-negative"

    ref = double_conv_reference(x, params)
    max_err = float(jnp.max(jnp.abs(out - ref)))
    assert max_err < 1e-1, f"mismatch vs reference: max_err={max_err}"
    print("KERNEL_OK")
</pallas_src>

<mosaic_0001>
module attributes {stable_mosaic.version = 11 : i64} {
  func.func @_double_conv_kernel(%arg0: i32, %arg1: memref<4x1024xf32, #tpu.memory_space<vmem>>, %arg2: memref<1x946xf32, #tpu.memory_space<vmem>>, %arg3: memref<9x8x4xbf16, #tpu.memory_space<vmem>>, %arg4: memref<8x1xf32, #tpu.memory_space<vmem>>, %arg5: memref<8x1xf32, #tpu.memory_space<vmem>>, %arg6: memref<9x8x8xbf16, #tpu.memory_space<vmem>>, %arg7: memref<8x1xf32, #tpu.memory_space<vmem>>, %arg8: memref<8x1xf32, #tpu.memory_space<vmem>>, %arg9: memref<2x8x512xf32, #tpu.memory_space<vmem>>) attributes {dimension_semantics = [#tpu.dimension_semantics<parallel>], iteration_bounds = array<i64: 1>, scalar_prefetch = 0 : i64, scratch_operands = 0 : i64, tpu.core_type = #tpu.core_type<tc>, window_params = [{transform_indices = @transform_0, window_bounds = array<i64: 4, 1024>}, {pipeline_mode = #tpu.pipeline_mode<synchronous>, transform_indices = @transform_1, window_bounds = array<i64: 1, 946>}, {pipeline_mode = #tpu.pipeline_mode<synchronous>, transform_indices = @transform_2, window_bounds = array<i64: 9, 8, 4>}, {pipeline_mode = #tpu.pipeline_mode<synchronous>, transform_indices = @transform_3, window_bounds = array<i64: 8, 1>}, {pipeline_mode = #tpu.pipeline_mode<synchronous>, transform_indices = @transform_4, window_bounds = array<i64: 8, 1>}, {pipeline_mode = #tpu.pipeline_mode<synchronous>, transform_indices = @transform_5, window_bounds = array<i64: 9, 8, 8>}, {pipeline_mode = #tpu.pipeline_mode<synchronous>, transform_indices = @transform_6, window_bounds = array<i64: 8, 1>}, {pipeline_mode = #tpu.pipeline_mode<synchronous>, transform_indices = @transform_7, window_bounds = array<i64: 8, 1>}, {transform_indices = @transform_8, window_bounds = array<i64: 2, 8, 512>}]} {
    %c0 = arith.constant 0 : index
    %c0_0 = arith.constant 0 : index
    %0 = vector.load %arg1[%c0, %c0_0] : memref<4x1024xf32, #tpu.memory_space<vmem>>, vector<4x1024xf32>
    %1 = arith.truncf %0 : vector<4x1024xf32> to vector<4x1024xbf16>
    %c0_1 = arith.constant 0 : index
    %c0_2 = arith.constant 0 : index
    %c0_3 = arith.constant 0 : index
    %2 = vector.load %arg3[%c0_1, %c0_2, %c0_3] : memref<9x8x4xbf16, #tpu.memory_space<vmem>>, vector<9x8x4xbf16>
    %c0_4 = arith.constant 0 : index
    %c0_5 = arith.constant 0 : index
    %c0_6 = arith.constant 0 : index
    %3 = vector.load %arg6[%c0_4, %c0_5, %c0_6] : memref<9x8x8xbf16, #tpu.memory_space<vmem>>, vector<9x8x8xbf16>
    %cst = arith.constant 0.000000e+00 : f32
    %4 = vector.broadcast %cst : f32 to vector<8x946xf32>
    %5 = vector.extract_strided_slice %2 {offsets = [0, 0, 0], sizes = [1, 8, 4], strides = [1, 1, 1]} : vector<9x8x4xbf16> to vector<1x8x4xbf16>
    %6 = vector.shape_cast %5 : vector<1x8x4xbf16> to vector<8x4xbf16>
    %7 = vector.extract_strided_slice %1 {offsets = [0, 0], sizes = [4, 946], strides = [1, 1]} : vector<4x1024xbf16> to vector<4x946xbf16>
    %cst_7 = arith.constant dense<0.000000e+00> : vector<8x946xf32>
    %8 = tpu.matmul %6, %7, %cst_7 {dimension_numbers = #tpu.dot_dimension_numbers<[1], [0], [0], [1], [0, 0, 1, 1], [], []>} : vector<8x4xbf16>, vector<4x946xbf16>, vector<8x946xf32> -> vector<8x946xf32>
    %9 = arith.addf %4, %8 : vector<8x946xf32>
    %10 = vector.extract_strided_slice %2 {offsets = [1, 0, 0], sizes = [1, 8, 4], strides = [1, 1, 1]} : vector<9x8x4xbf16> to vector<1x8x4xbf16>
    %11 = vector.shape_cast %10 : vector<1x8x4xbf16> to vector<8x4xbf16>
    %12 = vector.extract_strided_slice %1 {offsets = [0, 1], sizes = [4, 946], strides = [1, 1]} : vector<4x1024xbf16> to vector<4x946xbf16>
    %cst_8 = arith.constant dense<0.000000e+00> : vector<8x946xf32>
    %13 = tpu.matmul %11, %12, %cst_8 {dimension_numbers = #tpu.dot_dimension_numbers<[1], [0], [0], [1], [0, 0, 1, 1], [], []>} : vector<8x4xbf16>, vector<4x946xbf16>, vector<8x946xf32> -> vector<8x946xf32>
    %14 = arith.addf %9, %13 : vector<8x946xf32>
    %15 = vector.extract_strided_slice %2 {offsets = [2, 0, 0], sizes = [1, 8, 4], strides = [1, 1, 1]} : vector<9x8x4xbf16> to vector<1x8x4xbf16>
    %16 = vector.shape_cast %15 : vector<1x8x4xbf16> to vector<8x4xbf16>
    %17 = vector.extract_strided_slice %1 {offsets = [0, 2], sizes = [4, 946], strides = [1, 1]} : vector<4x1024xbf16> to vector<4x946xbf16>
    %cst_9 = arith.constant dense<0.000000e+00> : vector<8x946xf32>
    %18 = tpu.matmul %16, %17, %cst_9 {dimension_numbers = #tpu.dot_dimension_numbers<[1], [0], [0], [1], [0, 0, 1, 1], [], []>} : vector<8x4xbf16>, vector<4x946xbf16>, vector<8x946xf32> -> vector<8x946xf32>
    %19 = arith.addf %14, %18 : vector<8x946xf32>
    %20 = vector.extract_strided_slice %2 {offsets = [3, 0, 0], sizes = [1, 8, 4], strides = [1, 1, 1]} : vector<9x8x4xbf16> to vector<1x8x4xbf16>
    %21 = vector.shape_cast %20 : vector<1x8x4xbf16> to vector<8x4xbf16>
    %22 = vector.extract_strided_slice %1 {offsets = [0, 24], sizes = [4, 946], strides = [1, 1]} : vector<4x1024xbf16> to vector<4x946xbf16>
    %cst_10 = arith.constant dense<0.000000e+00> : vector<8x946xf32>
    %23 = tpu.matmul %21, %22, %cst_10 {dimension_numbers = #tpu.dot_dimension_numbers<[1], [0], [0], [1], [0, 0, 1, 1], [], []>} : vector<8x4xbf16>, vector<4x946xbf16>, vector<8x946xf32> -> vector<8x946xf32>
    %24 = arith.addf %19, %23 : vector<8x946xf32>
    %25 = vector.extract_strided_slice %2 {offsets = [4, 0, 0], sizes = [1, 8, 4], strides = [1, 1, 1]} : vector<9x8x4xbf16> to vector<1x8x4xbf16>
    %26 = vector.shape_cast %25 : vector<1x8x4xbf16> to vector<8x4xbf16>
    %27 = vector.extract_strided_slice %1 {offsets = [0, 25], sizes = [4, 946], strides = [1, 1]} : vector<4x1024xbf16> to vector<4x946xbf16>
    %cst_11 = arith.constant dense<0.000000e+00> : vector<8x946xf32>
    %28 = tpu.matmul %26, %27, %cst_11 {dimension_numbers = #tpu.dot_dimension_numbers<[1], [0], [0], [1], [0, 0, 1, 1], [], []>} : vector<8x4xbf16>, vector<4x946xbf16>, vector<8x946xf32> -> vector<8x946xf32>
    %29 = arith.addf %24, %28 : vector<8x946xf32>
    %30 = vector.extract_strided_slice %2 {offsets = [5, 0, 0], sizes = [1, 8, 4], strides = [1, 1, 1]} : vector<9x8x4xbf16> to vector<1x8x4xbf16>
    %31 = vector.shape_cast %30 : vector<1x8x4xbf16> to vector<8x4xbf16>
    %32 = vector.extract_strided_slice %1 {offsets = [0, 26], sizes = [4, 946], strides = [1, 1]} : vector<4x1024xbf16> to vector<4x946xbf16>
    %cst_12 = arith.constant dense<0.000000e+00> : vector<8x946xf32>
    %33 = tpu.matmul %31, %32, %cst_12 {dimension_numbers = #tpu.dot_dimension_numbers<[1], [0], [0], [1], [0, 0, 1, 1], [], []>} : vector<8x4xbf16>, vector<4x946xbf16>, vector<8x946xf32> -> vector<8x946xf32>
    %34 = arith.addf %29, %33 : vector<8x946xf32>
    %35 = vector.extract_strided_slice %2 {offsets = [6, 0, 0], sizes = [1, 8, 4], strides = [1, 1, 1]} : vector<9x8x4xbf16> to vector<1x8x4xbf16>
    %36 = vector.shape_cast %35 : vector<1x8x4xbf16> to vector<8x4xbf16>
    %37 = vector.extract_strided_slice %1 {offsets = [0, 48], sizes = [4, 946], strides = [1, 1]} : vector<4x1024xbf16> to vector<4x946xbf16>
    %cst_13 = arith.constant dense<0.000000e+00> : vector<8x946xf32>
    %38 = tpu.matmul %36, %37, %cst_13 {dimension_numbers = #tpu.dot_dimension_numbers<[1], [0], [0], [1], [0, 0, 1, 1], [], []>} : vector<8x4xbf16>, vector<4x946xbf16>, vector<8x946xf32> -> vector<8x946xf32>
    %39 = arith.addf %34, %38 : vector<8x946xf32>
    %40 = vector.extract_strided_slice %2 {offsets = [7, 0, 0], sizes = [1, 8, 4], strides = [1, 1, 1]} : vector<9x8x4xbf16> to vector<1x8x4xbf16>
    %41 = vector.shape_cast %40 : vector<1x8x4xbf16> to vector<8x4xbf16>
    %42 = vector.extract_strided_slice %1 {offsets = [0, 49], sizes = [4, 946], strides = [1, 1]} : vector<4x1024xbf16> to vector<4x946xbf16>
    %cst_14 = arith.constant dense<0.000000e+00> : vector<8x946xf32>
    %43 = tpu.matmul %41, %42, %cst_14 {dimension_numbers = #tpu.dot_dimension_numbers<[1], [0], [0], [1], [0, 0, 1, 1], [], []>} : vector<8x4xbf16>, vector<4x946xbf16>, vector<8x946xf32> -> vector<8x946xf32>
    %44 = arith.addf %39, %43 : vector<8x946xf32>
    %45 = vector.extract_strided_slice %2 {offsets = [8, 0, 0], sizes = [1, 8, 4], strides = [1, 1, 1]} : vector<9x8x4xbf16> to vector<1x8x4xbf16>
    %46 = vector.shape_cast %45 : vector<1x8x4xbf16> to vector<8x4xbf16>
    %47 = vector.extract_strided_slice %1 {offsets = [0, 50], sizes = [4, 946], strides = [1, 1]} : vector<4x1024xbf16> to vector<4x946xbf16>
    %cst_15 = arith.constant dense<0.000000e+00> : vector<8x946xf32>
    %48 = tpu.matmul %46, %47, %cst_15 {dimension_numbers = #tpu.dot_dimension_numbers<[1], [0], [0], [1], [0, 0, 1, 1], [], []>} : vector<8x4xbf16>, vector<4x946xbf16>, vector<8x946xf32> -> vector<8x946xf32>
    %49 = arith.addf %44, %48 : vector<8x946xf32>
    %c0_16 = arith.constant 0 : index
    %c0_17 = arith.constant 0 : index
    %50 = vector.load %arg4[%c0_16, %c0_17] : memref<8x1xf32, #tpu.memory_space<vmem>>, vector<8x1xf32>
    %51 = vector.broadcast %50 : vector<8x1xf32> to vector<8x946xf32>
    %52 = arith.mulf %49, %51 : vector<8x946xf32>
    %c0_18 = arith.constant 0 : index
    %c0_19 = arith.constant 0 : index
    %53 = vector.load %arg5[%c0_18, %c0_19] : memref<8x1xf32, #tpu.memory_space<vmem>>, vector<8x1xf32>
    %54 = vector.broadcast %53 : vector<8x1xf32> to vector<8x946xf32>
    %55 = arith.addf %52, %54 : vector<8x946xf32>
    %cst_20 = arith.constant 0.000000e+00 : f32
    %56 = vector.broadcast %cst_20 : f32 to vector<8x946xf32>
    %57 = arith.maximumf %55, %56 : vector<8x946xf32>
    %c0_21 = arith.constant 0 : index
    %c0_22 = arith.constant 0 : index
    %58 = vector.load %arg2[%c0_21, %c0_22] : memref<1x946xf32, #tpu.memory_space<vmem>>, vector<1x946xf32>
    %59 = vector.broadcast %58 : vector<1x946xf32> to vector<8x946xf32>
    %60 = arith.mulf %57, %59 : vector<8x946xf32>
    %61 = arith.truncf %60 : vector<8x946xf32> to vector<8x946xbf16>
    %cst_23 = arith.constant 0.000000e+00 : f32
    %62 = vector.broadcast %cst_23 : f32 to vector<8x896xf32>
    %63 = vector.extract_strided_slice %3 {offsets = [0, 0, 0], sizes = [1, 8, 8], strides = [1, 1, 1]} : vector<9x8x8xbf16> to vector<1x8x8xbf16>
    %64 = vector.shape_cast %63 : vector<1x8x8xbf16> to vector<8x8xbf16>
    %65 = vector.extract_strided_slice %61 {offsets = [0, 0], sizes = [8, 896], strides = [1, 1]} : vector<8x946xbf16> to vector<8x896xbf16>
    %cst_24 = arith.constant dense<0.000000e+00> : vector<8x896xf32>
    %66 = tpu.matmul %64, %65, %cst_24 {dimension_numbers = #tpu.dot_dimension_numbers<[1], [0], [0], [1], [0, 0, 1, 1], [], []>} : vector<8x8xbf16>, vector<8x896xbf16>, vector<8x896xf32> -> vector<8x896xf32>
    %67 = arith.addf %62, %66 : vector<8x896xf32>
    %68 = vector.extract_strided_slice %3 {offsets = [1, 0, 0], sizes = [1, 8, 8], strides = [1, 1, 1]} : vector<9x8x8xbf16> to vector<1x8x8xbf16>
    %69 = vector.shape_cast %68 : vector<1x8x8xbf16> to vector<8x8xbf16>
    %70 = vector.extract_strided_slice %61 {offsets = [0, 1], sizes = [8, 896], strides = [1, 1]} : vector<8x946xbf16> to vector<8x896xbf16>
    %cst_25 = arith.constant dense<0.000000e+00> : vector<8x896xf32>
    %71 = tpu.matmul %69, %70, %cst_25 {dimension_numbers = #tpu.dot_dimension_numbers<[1], [0], [0], [1], [0, 0, 1, 1], [], []>} : vector<8x8xbf16>, vector<8x896xbf16>, vector<8x896xf32> -> vector<8x896xf32>
    %72 = arith.addf %67, %71 : vector<8x896xf32>
    %73 = vector.extract_strided_slice %3 {offsets = [2, 0, 0], sizes = [1, 8, 8], strides = [1, 1, 1]} : vector<9x8x8xbf16> to vector<1x8x8xbf16>
    %74 = vector.shape_cast %73 : vector<1x8x8xbf16> to vector<8x8xbf16>
    %75 = vector.extract_strided_slice %61 {offsets = [0, 2], sizes = [8, 896], strides = [1, 1]} : vector<8x946xbf16> to vector<8x896xbf16>
    %cst_26 = arith.constant dense<0.000000e+00> : vector<8x896xf32>
    %76 = tpu.matmul %74, %75, %cst_26 {dimension_numbers = #tpu.dot_dimension_numbers<[1], [0], [0], [1], [0, 0, 1, 1], [], []>} : vector<8x8xbf16>, vector<8x896xbf16>, vector<8x896xf32> -> vector<8x896xf32>
    %77 = arith.addf %72, %76 : vector<8x896xf32>
    %78 = vector.extract_strided_slice %3 {offsets = [3, 0, 0], sizes = [1, 8, 8], strides = [1, 1, 1]} : vector<9x8x8xbf16> to vector<1x8x8xbf16>
    %79 = vector.shape_cast %78 : vector<1x8x8xbf16> to vector<8x8xbf16>
    %80 = vector.extract_strided_slice %61 {offsets = [0, 24], sizes = [8, 896], strides = [1, 1]} : vector<8x946xbf16> to vector<8x896xbf16>
    %cst_27 = arith.constant dense<0.000000e+00> : vector<8x896xf32>
    %81 = tpu.matmul %79, %80, %cst_27 {dimension_numbers = #tpu.dot_dimension_numbers<[1], [0], [0], [1], [0, 0, 1, 1], [], []>} : vector<8x8xbf16>, vector<8x896xbf16>, vector<8x896xf32> -> vector<8x896xf32>
    %82 = arith.addf %77, %81 : vector<8x896xf32>
    %83 = vector.extract_strided_slice %3 {offsets = [4, 0, 0], sizes = [1, 8, 8], strides = [1, 1, 1]} : vector<9x8x8xbf16> to vector<1x8x8xbf16>
    %84 = vector.shape_cast %83 : vector<1x8x8xbf16> to vector<8x8xbf16>
    %85 = vector.extract_strided_slice %61 {offsets = [0, 25], sizes = [8, 896], strides = [1, 1]} : vector<8x946xbf16> to vector<8x896xbf16>
    %cst_28 = arith.constant dense<0.000000e+00> : vector<8x896xf32>
    %86 = tpu.matmul %84, %85, %cst_28 {dimension_numbers = #tpu.dot_dimension_numbers<[1], [0], [0], [1], [0, 0, 1, 1], [], []>} : vector<8x8xbf16>, vector<8x896xbf16>, vector<8x896xf32> -> vector<8x896xf32>
    %87 = arith.addf %82, %86 : vector<8x896xf32>
    %88 = vector.extract_strided_slice %3 {offsets = [5, 0, 0], sizes = [1, 8, 8], strides = [1, 1, 1]} : vector<9x8x8xbf16> to vector<1x8x8xbf16>
    %89 = vector.shape_cast %88 : vector<1x8x8xbf16> to vector<8x8xbf16>
    %90 = vector.extract_strided_slice %61 {offsets = [0, 26], sizes = [8, 896], strides = [1, 1]} : vector<8x946xbf16> to vector<8x896xbf16>
    %cst_29 = arith.constant dense<0.000000e+00> : vector<8x896xf32>
    %91 = tpu.matmul %89, %90, %cst_29 {dimension_numbers = #tpu.dot_dimension_numbers<[1], [0], [0], [1], [0, 0, 1, 1], [], []>} : vector<8x8xbf16>, vector<8x896xbf16>, vector<8x896xf32> -> vector<8x896xf32>
    %92 = arith.addf %87, %91 : vector<8x896xf32>
    %93 = vector.extract_strided_slice %3 {offsets = [6, 0, 0], sizes = [1, 8, 8], strides = [1, 1, 1]} : vector<9x8x8xbf16> to vector<1x8x8xbf16>
    %94 = vector.shape_cast %93 : vector<1x8x8xbf16> to vector<8x8xbf16>
    %95 = vector.extract_strided_slice %61 {offsets = [0, 48], sizes = [8, 896], strides = [1, 1]} : vector<8x946xbf16> to vector<8x896xbf16>
    %cst_30 = arith.constant dense<0.000000e+00> : vector<8x896xf32>
    %96 = tpu.matmul %94, %95, %cst_30 {dimension_numbers = #tpu.dot_dimension_numbers<[1], [0], [0], [1], [0, 0, 1, 1], [], []>} : vector<8x8xbf16>, vector<8x896xbf16>, vector<8x896xf32> -> vector<8x896xf32>
    %97 = arith.addf %92, %96 : vector<8x896xf32>
    %98 = vector.extract_strided_slice %3 {offsets = [7, 0, 0], sizes = [1, 8, 8], strides = [1, 1, 1]} : vector<9x8x8xbf16> to vector<1x8x8xbf16>
    %99 = vector.shape_cast %98 : vector<1x8x8xbf16> to vector<8x8xbf16>
    %100 = vector.extract_strided_slice %61 {offsets = [0, 49], sizes = [8, 896], strides = [1, 1]} : vector<8x946xbf16> to vector<8x896xbf16>
    %cst_31 = arith.constant dense<0.000000e+00> : vector<8x896xf32>
    %101 = tpu.matmul %99, %100, %cst_31 {dimension_numbers = #tpu.dot_dimension_numbers<[1], [0], [0], [1], [0, 0, 1, 1], [], []>} : vector<8x8xbf16>, vector<8x896xbf16>, vector<8x896xf32> -> vector<8x896xf32>
    %102 = arith.addf %97, %101 : vector<8x896xf32>
    %103 = vector.extract_strided_slice %3 {offsets = [8, 0, 0], sizes = [1, 8, 8], strides = [1, 1, 1]} : vector<9x8x8xbf16> to vector<1x8x8xbf16>
    %104 = vector.shape_cast %103 : vector<1x8x8xbf16> to vector<8x8xbf16>
    %105 = vector.extract_strided_slice %61 {offsets = [0, 50], sizes = [8, 896], strides = [1, 1]} : vector<8x946xbf16> to vector<8x896xbf16>
    %cst_32 = arith.constant dense<0.000000e+00> : vector<8x896xf32>
    %106 = tpu.matmul %104, %105, %cst_32 {dimension_numbers = #tpu.dot_dimension_numbers<[1], [0], [0], [1], [0, 0, 1, 1], [], []>} : vector<8x8xbf16>, vector<8x896xbf16>, vector<8x896xf32> -> vector<8x896xf32>
    %107 = arith.addf %102, %106 : vector<8x896xf32>
    %c0_33 = arith.constant 0 : index
    %c0_34 = arith.constant 0 : index
    %108 = vector.load %arg7[%c0_33, %c0_34] : memref<8x1xf32, #tpu.memory_space<vmem>>, vector<8x1xf32>
    %109 = vector.broadcast %108 : vector<8x1xf32> to vector<8x896xf32>
    %110 = arith.mulf %107, %109 : vector<8x896xf32>
    %c0_35 = arith.constant 0 : index
    %c0_36 = arith.constant 0 : index
    %111 = vector.load %arg8[%c0_35, %c0_36] : memref<8x1xf32, #tpu.memory_space<vmem>>, vector<8x1xf32>
    %112 = vector.broadcast %111 : vector<8x1xf32> to vector<8x896xf32>
    %113 = arith.addf %110, %112 : vector<8x896xf32>
    %cst_37 = arith.constant 0.000000e+00 : f32
    %114 = vector.broadcast %cst_37 : f32 to vector<8x896xf32>
    %115 = arith.maximumf %113, %114 : vector<8x896xf32>
    %116 = vector.extract_strided_slice %115 {offsets = [0, 0], sizes = [8, 384], strides = [1, 1]} : vector<8x896xf32> to vector<8x384xf32>
    %c0_38 = arith.constant 0 : index
    %c0_39 = arith.constant 0 : index
    %c0_40 = arith.constant 0 : index
    %117 = vector.load %arg9[%c0_38, %c0_39, %c0_40] : memref<2x8x512xf32, #tpu.memory_space<vmem>>, vector<1x8x384xf32>
    %118 = vector.shape_cast %117 : vector<1x8x384xf32> to vector<8x384xf32>
    %119 = vector.shape_cast %116 : vector<8x384xf32> to vector<1x8x384xf32>
    tpu.vector_store %arg9[%c0_38, %c0_39, %c0_40], %119 {strides = array<i32>} : memref<2x8x512xf32, #tpu.memory_space<vmem>>, vector<1x8x384xf32>,
    %cst_41 = arith.constant 0.000000e+00 : f32
    %120 = vector.broadcast %cst_41 : f32 to vector<8x128xf32>
    %c0_42 = arith.constant 0 : index
    %c0_43 = arith.constant 0 : index
    %c384 = arith.constant 384 : index
    %121 = vector.load %arg9[%c0_42, %c0_43, %c384] : memref<2x8x512xf32, #tpu.memory_space<vmem>>, vector<1x8x128xf32>
    %122 = vector.shape_cast %121 : vector<1x8x128xf32> to vector<8x128xf32>
    %123 = vector.shape_cast %120 : vector<8x128xf32> to vector<1x8x128xf32>
    tpu.vector_store %arg9[%c0_42, %c0_43, %c384], %123 {strides = array<i32>} : memref<2x8x512xf32, #tpu.memory_space<vmem>>, vector<1x8x128xf32>,
    %124 = vector.extract_strided_slice %115 {offsets = [0, 512], sizes = [8, 384], strides = [1, 1]} : vector<8x896xf32> to vector<8x384xf32>
    %c1 = arith.constant 1 : index
    %c0_44 = arith.constant 0 : index
    %c0_45 = arith.constant 0 : index
    %125 = vector.load %arg9[%c1, %c0_44, %c0_45] : memref<2x8x512xf32, #tpu.memory_space<vmem>>, vector<1x8x384xf32>
    %126 = vector.shape_cast %125 : vector<1x8x384xf32> to vector<8x384xf32>
    %127 = vector.shape_cast %124 : vector<8x384xf32> to vector<1x8x384xf32>
    tpu.vector_store %arg9[%c1, %c0_44, %c0_45], %127 {strides = array<i32>} : memref<2x8x512xf32, #tpu.memory_space<vmem>>, vector<1x8x384xf32>,
    %cst_46 = arith.constant 0.000000e+00 : f32
    %128 = vector.broadcast %cst_46 : f32 to vector<8x128xf32>
    %c1_47 = arith.constant 1 : index
    %c0_48 = arith.constant 0 : index
    %c384_49 = arith.constant 384 : index
    %129 = vector.load %arg9[%c1_47, %c0_48, %c384_49] : memref<2x8x512xf32, #tpu.memory_space<vmem>>, vector<1x8x128xf32>
    %130 = vector.shape_cast %129 : vector<1x8x128xf32> to vector<8x128xf32>
    %131 = vector.shape_cast %128 : vector<8x128xf32> to vector<1x8x128xf32>
    tpu.vector_store %arg9[%c1_47, %c0_48, %c384_49], %131 {strides = array<i32>} : memref<2x8x512xf32, #tpu.memory_space<vmem>>, vector<1x8x128xf32>,
    return
  }
  func.func @transform_0(%arg0: i32) -> (i32, i32) {
    %c0_i32 = arith.constant 0 : i32
    %c0_i32_0 = arith.constant 0 : i32
    return %c0_i32, %arg0 : i32, i32
  }
  func.func @transform_1(%arg0: i32) -> (i32, i32) {
    %c0_i32 = arith.constant 0 : i32
    %c0_i32_0 = arith.constant 0 : i32
    %c0_i32_1 = arith.constant 0 : i32
    return %c0_i32, %c0_i32_0 : i32, i32
  }
  func.func @transform_2(%arg0: i32) -> (i32, i32, i32) {
    %c0_i32 = arith.constant 0 : i32
    %c0_i32_0 = arith.constant 0 : i32
    %c0_i32_1 = arith.constant 0 : i32
    %c0_i32_2 = arith.constant 0 : i32
    return %c0_i32, %c0_i32_0, %c0_i32_1 : i32, i32, i32
  }
  func.func @transform_3(%arg0: i32) -> (i32, i32) {
    %c0_i32 = arith.constant 0 : i32
    %c0_i32_0 = arith.constant 0 : i32
    %c0_i32_1 = arith.constant 0 : i32
    return %c0_i32, %c0_i32_0 : i32, i32
  }
  func.func @transform_4(%arg0: i32) -> (i32, i32) {
    %c0_i32 = arith.constant 0 : i32
    %c0_i32_0 = arith.constant 0 : i32
    %c0_i32_1 = arith.constant 0 : i32
    return %c0_i32, %c0_i32_0 : i32, i32
  }
  func.func @transform_5(%arg0: i32) -> (i32, i32, i32) {
    %c0_i32 = arith.constant 0 : i32
    %c0_i32_0 = arith.constant 0 : i32
    %c0_i32_1 = arith.constant 0 : i32
    %c0_i32_2 = arith.constant 0 : i32
    return %c0_i32, %c0_i32_0, %c0_i32_1 : i32, i32, i32
  }
  func.func @transform_6(%arg0: i32) -> (i32, i32) {
    %c0_i32 = arith.constant 0 : i32
    %c0_i32_0 = arith.constant 0 : i32
    %c0_i32_1 = arith.constant 0 : i32
    return %c0_i32, %c0_i32_0 : i32, i32
  }
  func.func @transform_7(%arg0: i32) -> (i32, i32) {
    %c0_i32 = arith.constant 0 : i32
    %c0_i32_0 = arith.constant 0 : i32
    %c0_i32_1 = arith.constant 0 : i32
    return %c0_i32, %c0_i32_0 : i32, i32
  }
  func.func @transform_8(%arg0: i32) -> (i32, i32, i32) {
    %c0_i32 = arith.constant 0 : i32
    %c0_i32_0 = arith.constant 0 : i32
    %c0_i32_1 = arith.constant 0 : i32
    return %arg0, %c0_i32, %c0_i32_0 : i32, i32, i32
  }
}

</mosaic_0001>

<bundles_post_ra>
// kernel: tpu_custom_call.1
= control target key start
LH: loop header
LB: loop body
LE: loop exit
PB: predicated region body
PF: predicated region fallthrough
CT: control target
= control target key end

     0   :  { %s5374_s0 = inlined_call_operand.vmem [shape: f32[4,1024], index: 0, kind: input, shape index: {}]   ;;  %s5375_s1 = inlined_call_operand.vmem [shape: f32[1,946], index: 1, kind: input, shape index: {}]   ;;  %s5376_s2 = inlined_call_operand.vmem [shape: bf16[9,8,4], index: 2, kind: input, shape index: {}]   ;;  %s5377_s3 = inlined_call_operand.vmem [shape: f32[8,1], index: 3, kind: input, shape index: {}]   ;;  %s5378_s4 = inlined_call_operand.vmem [shape: f32[8,1], index: 4, kind: input, shape index: {}]   ;;  %s5379_s5 = inlined_call_operand.vmem [shape: bf16[9,8,8], index: 5, kind: input, shape index: {}]   ;;  %s5380_s6 = inlined_call_operand.vmem [shape: f32[8,1], index: 6, kind: input, shape index: {}]   ;;  %s5381_s7 = inlined_call_operand.vmem [shape: f32[8,1], index: 7, kind: input, shape index: {}]   ;;  %s5382_s8 = inlined_call_operand.hbm [shape: f32[2,8,512], index: 8, kind: output, shape index: {}]  }
   0x1   :  { %v32_v0 = vld [vmem:[%s5374_s0 + $0x8] sm:$0xff]  ;;  %v31_v1 = vld [vmem:[%s5374_s0] sm:$0xff]  ;;  %v33_v2 = vld [vmem:[%s5374_s0 + $0x10] sm:$0xff] }
   0x2   :  { %v4426_v3 = vpack.c.bf16 %v32_v0, %v32_v0  ;;  %v4428_v4 = vpack.c.bf16 %v31_v1, %v31_v1  ;;  %v40_v5 = vcombine.high %v32_v0, %v32_v0  ;;  %v39_v6 = vcombine.high %v31_v1, %v31_v1 }
   0x3   :  { %13 = vsyncpa [#allocation3], 0  ;;  %s4358_s11 = smov 127   ;;  %v41_v9 = vcombine.high %v33_v2, %v33_v2  ;;  %v34_v10 = vld [vmem:[%s5374_s0 + $0x18] sm:$0xff]  ;;  %v4359_v11 = vmov 0   ;;  %v4451_v13 = vpack.c.bf16 %v33_v2, %v33_v2  ;;  %s4360_s0 = smov 126  }
   0x4   :  { %85 = vrot.lane.b32.xlu1 %v4426_v3, %s4358_s11  ;;  %81 = vrot.lane.b32.xlu0 %v4428_v4, %s4358_s11  ;;  %v4434_v7 = vpack.c.bf16 %v40_v5, %v40_v5  ;;  %v4436_v8 = vpack.c.bf16 %v39_v6, %v39_v6  ;;  %v42_v14 = vcombine.high %v34_v10, %v34_v10  ;;  %s4361_s14 = smov 104   ;;  %s4362_s15 = smov 103   ;;  %vm97_vm0 = vcmask 1039360   ;;  %v56_v24 = vld [vmem:[%s5376_s2 + $0x4] sm:$0xf] }
   0x5   :  { %166 = vmatprep.mubr.bf16.mxu0 %v4359_v11  ;;  %207 = vmatprep.mubr.bf16.mxu1 %v4359_v11  ;;  %v4449_v12 = vpack.c.bf16 %v41_v9, %v41_v9  ;;  %v4459_v16 = vpack.c.bf16 %v34_v10, %v34_v10  ;;  %s4363_s16 = smov 102   ;;  %s4364_s17 = smov 80   ;;  %vm109_vm1 = vcmask 1041408   ;;  %vm105_vm2 = vcmask 31744   ;;  %v55_v43 = vld [vmem:[%s5376_s2] sm:$0xf] }
   0x6   :  { %4330 = vset.pattern.permute.xlu0 %v4359_v11  ;;  %4331 = vset.pattern.permute.xlu1 %v4359_v11  ;;  %v4457_v15 = vpack.c.bf16 %v42_v14, %v42_v14  ;;  %s4365_s18 = smov 79   ;;  %s4366_s19 = smov 78   ;;  %v302_v37 = vsel %vm109_vm1, %v4428_v4, 0  ;;  %v308_v40 = vsel %vm109_vm1, %v4426_v3, 0  ;;  %vm505_vm3 = vcmask 1031168  }
   0x7   :  { %v314_v44 = vsel %vm109_vm1, %v4451_v13, 0  ;;  %v320_v48 = vsel %vm109_vm1, %v4459_v16, 0  ;;  %vm728_vm4 = vcmask 850944   ;;  %v57_v62 = vld [vmem:[%s5376_s2 + $0x8] sm:$0xf]  ;;  %vm951_vm5 = vcmask 842752  }
   0x8   :  { %87 = vrot.lane.b32.xlu1 %v4434_v7, %s4358_s11  ;;  %83 = vrot.lane.b32.xlu0 %v4436_v8, %s4358_s11  ;;  %vm1174_vm6 = vcmask 834560   ;;  %vm1397_vm7 = vcmask 654336   ;;  %vm1620_vm8 = vcmask 646144   ;;  %vm1843_vm9 = vcmask 637952  }
   0x9   :  { %vm2179_vm10 = vcmask 1043456   ;;  %vm2175_vm11 = vcmask 64512   ;;  %vm4368_vm12 = vmmov 0  }
   0xc   :  { %91 = vrot.lane.b32.xlu1 %v4449_v12, %s4358_s11  ;;  %89 = vrot.lane.b32.xlu0 %v4451_v13, %s4358_s11 }
  0x10   :  { %95 = vrot.lane.b32.xlu1 %v4457_v15, %s4358_s11  ;;  %93 = vrot.lane.b32.xlu0 %v4459_v16, %s4358_s11 }
  0x14   :  { %489 = vrot.lane.b32.xlu0 %v4428_v4, %s4360_s0  ;;  %491 = vrot.lane.b32.xlu1 %v4436_v8, %s4360_s0 }
  0x18   :  { %493 = vrot.lane.b32.xlu0 %v4426_v3, %s4360_s0  ;;  %495 = vrot.lane.b32.xlu1 %v4434_v7, %s4360_s0 }
  0x1c   :  { %497 = vrot.lane.b32.xlu0 %v4451_v13, %s4360_s0  ;;  %499 = vrot.lane.b32.xlu1 %v4449_v12, %s4360_s0 }
  0x20   :  { %501 = vrot.lane.b32.xlu0 %v4459_v16, %s4360_s0  ;;  %503 = vrot.lane.b32.xlu1 %v4457_v15, %s4360_s0 }
  0x24   :  { %712 = vrot.lane.b32.xlu0 %v4428_v4, %s4361_s14  ;;  %714 = vrot.lane.b32.xlu1 %v4436_v8, %s4361_s14 }
  0x28   :  { %716 = vrot.lane.b32.xlu0 %v4426_v3, %s4361_s14  ;;  %718 = vrot.lane.b32.xlu1 %v4434_v7, %s4361_s14 }
  0x2c   :  { %720 = vrot.lane.b32.xlu0 %v4451_v13, %s4361_s14  ;;  %722 = vrot.lane.b32.xlu1 %v4449_v12, %s4361_s14 }
  0x30   :  { %724 = vrot.lane.b32.xlu0 %v4459_v16, %s4361_s14  ;;  %726 = vrot.lane.b32.xlu1 %v4457_v15, %s4361_s14 }
  0x34   :  { %935 = vrot.lane.b32.xlu0 %v4428_v4, %s4362_s15  ;;  %937 = vrot.lane.b32.xlu1 %v4436_v8, %s4362_s15 }
  0x38   :  { %939 = vrot.lane.b32.xlu0 %v4426_v3, %s4362_s15  ;;  %941 = vrot.lane.b32.xlu1 %v4434_v7, %s4362_s15 }
  0x3c   :  { %943 = vrot.lane.b32.xlu0 %v4451_v13, %s4362_s15  ;;  %945 = vrot.lane.b32.xlu1 %v4449_v12, %s4362_s15 }
  0x40   :  { %947 = vrot.lane.b32.xlu0 %v4459_v16, %s4362_s15  ;;  %949 = vrot.lane.b32.xlu1 %v4457_v15, %s4362_s15 }
  0x44   :  { %1158 = vrot.lane.b32.xlu0 %v4428_v4, %s4363_s16  ;;  %1160 = vrot.lane.b32.xlu1 %v4436_v8, %s4363_s16 }
  0x48   :  { %1162 = vrot.lane.b32.xlu0 %v4426_v3, %s4363_s16  ;;  %1164 = vrot.lane.b32.xlu1 %v4434_v7, %s4363_s16 }
  0x4c   :  { %1166 = vrot.lane.b32.xlu0 %v4451_v13, %s4363_s16  ;;  %1168 = vrot.lane.b32.xlu1 %v4449_v12, %s4363_s16 }
  0x50   :  { %1170 = vrot.lane.b32.xlu0 %v4459_v16, %s4363_s16  ;;  %1172 = vrot.lane.b32.xlu1 %v4457_v15, %s4363_s16 }
  0x54   :  { %1381 = vrot.lane.b32.xlu0 %v4428_v4, %s4364_s17  ;;  %1383 = vrot.lane.b32.xlu1 %v4436_v8, %s4364_s17 }
  0x58   :  { %1385 = vrot.lane.b32.xlu0 %v4426_v3, %s4364_s17  ;;  %1387 = vrot.lane.b32.xlu1 %v4434_v7, %s4364_s17 }
  0x5c   :  { %1389 = vrot.lane.b32.xlu0 %v4451_v13, %s4364_s17  ;;  %1391 = vrot.lane.b32.xlu1 %v4449_v12, %s4364_s17 }
  0x60   :  { %1393 = vrot.lane.b32.xlu0 %v4459_v16, %s4364_s17  ;;  %1395 = vrot.lane.b32.xlu1 %v4457_v15, %s4364_s17 }
  0x64   :  { %1604 = vrot.lane.b32.xlu0 %v4428_v4, %s4365_s18  ;;  %1606 = vrot.lane.b32.xlu1 %v4436_v8, %s4365_s18 }
  0x68   :  { %1608 = vrot.lane.b32.xlu0 %v4426_v3, %s4365_s18  ;;  %1610 = vrot.lane.b32.xlu1 %v4434_v7, %s4365_s18 }
  0x6c   :  { %1612 = vrot.lane.b32.xlu0 %v4451_v13, %s4365_s18  ;;  %1614 = vrot.lane.b32.xlu1 %v4449_v12, %s4365_s18 }
  0x70   :  { %1616 = vrot.lane.b32.xlu0 %v4459_v16, %s4365_s18  ;;  %1618 = vrot.lane.b32.xlu1 %v4457_v15, %s4365_s18 }
  0x74   :  { %1827 = vrot.lane.b32.xlu0 %v4428_v4, %s4366_s19  ;;  %1829 = vrot.lane.b32.xlu1 %v4436_v8, %s4366_s19 }
  0x76   :  { %v86_v17 = vpop.permute.xlu1 %85  ;;  %v82_v18 = vpop.permute.xlu0 %81 }
  0x78   :  { %1831 = vrot.lane.b32.xlu0 %v4426_v3, %s4366_s19  ;;  %1833 = vrot.lane.b32.xlu1 %v4434_v7, %s4366_s19 }
  0x7a   :  { %v88_v19 = vpop.permute.xlu1 %87  ;;  %v84_v20 = vpop.permute.xlu0 %83 }
  0x7b   :  { %v99_v21 = vsel %vm97_vm0, %v84_v20, %v86_v17  ;;  %v98_v22 = vsel %vm97_vm0, %v82_v18, %v84_v20  ;;  %v100_v25 = vsel %vm97_vm0, %v86_v17, %v88_v19 }
  0x7c   :  { %4109 = vmatprep.subr.msk.bf16.mxu0 %vm109_vm1, %v99_v21  ;;  %v111_v23 = vsel %vm109_vm1, %v98_v22, 0  ;;  %1835 = vrot.lane.b32.xlu0 %v4451_v13, %s4366_s19  ;;  %v117_v29 = vsel %vm109_vm1, %v100_v25, 0 }
  0x7d   :  { %149 = vmatpush1.bf16.msra.mxu0 %v111_v23  ;;  %1837 = vrot.lane.b32.xlu1 %v4449_v12, %s4366_s19 }
  0x7e   :  { %v92_v26 = vpop.permute.xlu1 %91  ;;  %v90_v27 = vpop.permute.xlu0 %89 }
  0x7f   :  { %v101_v28 = vsel %vm97_vm0, %v88_v19, %v90_v27  ;;  %v102_v30 = vsel %vm97_vm0, %v90_v27, %v92_v26  ;;  %v58_v19 = vld [vmem:[%s5376_s2 + $0xc] sm:$0xf] }
  0x80   :  { %4110 = vmatmul.mubr.msk.bf16.vlgmr.msra.gmra.mxu0 %vm105_vm2, %v56_v24  ;;  %4111 = vmatprep.subr.msk.bf16.mxu1 %vm109_vm1, %v101_v28  ;;  %v123_v35 = vsel %vm109_vm1, %v102_v30, 0 }
  0x81   :  { %190 = vmatpush1.bf16.msra.mxu1 %v117_v29  ;;  %248 = vmatprep.mubr.bf16.mxu0 %v4359_v11 }
  0x82   :  { %v96_v31 = vpop.permute.xlu1 %95  ;;  %v94_v32 = vpop.permute.xlu0 %93  ;;  %1839 = vrot.lane.b32.xlu0 %v4459_v16, %s4366_s19  ;;  %1841 = vrot.lane.b32.xlu1 %v4457_v15, %s4366_s19 }
  0x83   :  { %v104_v33 = vsel %vm97_vm0, %v94_v32, %v96_v31  ;;  %v103_v34 = vsel %vm97_vm0, %v92_v26, %v94_v32  ;;  %4115 = vmatprep.subr.msk.bf16.mxu1 %vm109_vm1, %v96_v31 }
  0x84   :  { %4112 = vmatmul.mubr.msk.bf16.vlgmr.msra.gmra.mxu1 %vm105_vm2, %v56_v24  ;;  %4113 = vmatprep.subr.msk.bf16.mxu0 %vm109_vm1, %v103_v34  ;;  %v129_v36 = vsel %vm109_vm1, %v104_v33, 0 }
  0x85   :  { %231 = vmatpush1.bf16.msra.mxu0 %v123_v35  ;;  %272 = vmatpush1.bf16.msra.mxu1 %v129_v36 }
  0x86   :  { %289 = vmatprep.mubr.bf16.mxu1 %v4359_v11  ;;  %4117 = vmatprep.subr.msk.bf16.mxu0 %vm109_vm1, %v4436_v8  ;;  %v490_v38 = vpop.permute.xlu0 %489  ;;  %v492_v39 = vpop.permute.xlu1 %491 }
  0x87   :  { %4119 = vmatprep.subr.msk.bf16.mxu1 %vm109_vm1, %v4434_v7  ;;  %v506_v51 = vsel %vm505_vm3, %v490_v38, %v492_v39 }
  0x88   :  { %4114 = vmatmul.mubr.msk.bf16.vlgmr.msra.gmra.mxu0 %vm105_vm2, %v56_v24  ;;  %v517_v53 = vsel %vm109_vm1, %v506_v51, 0 }
  0x89   :  { %340 = vmatpush1.bf16.msra.mxu0 %v302_v37  ;;  %357 = vmatprep.mubr.bf16.mxu0 %v4359_v11 }
  0x8a   :  { %4121 = vmatprep.subr.msk.bf16.mxu0 %vm109_vm1, %v4449_v12  ;;  %v494_v41 = vpop.permute.xlu0 %493  ;;  %v496_v42 = vpop.permute.xlu1 %495 }
  0x8b   :  { %v507_v47 = vsel %vm505_vm3, %v492_v39, %v494_v41  ;;  %v508_v56 = vsel %vm505_vm3, %v494_v41, %v496_v42  ;;  %v59_v39 = vld [vmem:[%s5376_s2 + $0x10] sm:$0xf] }
  0x8c   :  { %4116 = vmatmul.mubr.msk.bf16.vlgmr.msra.gmra.mxu1 %vm105_vm2, %v56_v24  ;;  %v523_v58 = vsel %vm109_vm1, %v508_v56, 0  ;;  %v2064_v56 = vld [vmem:[%s5378_s4] sm:$0xff] }
  0x8d   :  { %381 = vmatpush1.bf16.msra.mxu1 %v308_v40  ;;  %398 = vmatprep.mubr.bf16.mxu1 %v4359_v11 }
  0x8e   :  { %4123 = vmatprep.subr.msk.bf16.mxu1 %vm109_vm1, %v4457_v15  ;;  %v498_v45 = vpop.permute.xlu0 %497  ;;  %v500_v46 = vpop.permute.xlu1 %499  ;;  %2067 = vperm.xlu1 %4331, %v2064_v56  }
  0x8f   :  { %v509_v52 = vsel %vm505_vm3, %v496_v42, %v498_v45  ;;  %v510_v61 = vsel %vm505_vm3, %v498_v45, %v500_v46 }
  0x90   :  { %4118 = vmatmul.mubr.msk.bf16.vlgmr.msra.gmra.mxu0 %vm105_vm2, %v55_v43  ;;  %v529_v63 = vsel %vm109_vm1, %v510_v61, 0  ;;  %v60_v61 = vld [vmem:[%s5376_s2 + $0x14] sm:$0xf] }
  0x91   :  { %422 = vmatpush1.bf16.msra.mxu0 %v314_v44  ;;  %439 = vmatprep.mubr.bf16.mxu0 %v4359_v11 }
  0x92   :  { %4125 = vmatprep.subr.msk.bf16.mxu0 %vm109_vm1, %v507_v47  ;;  %v502_v49 = vpop.permute.xlu0 %501  ;;  %v504_v50 = vpop.permute.xlu1 %503 }
  0x93   :  { %v511_v57 = vsel %vm505_vm3, %v500_v46, %v502_v49  ;;  %v512_v2 = vsel %vm505_vm3, %v502_v49, %v504_v50 }
  0x94   :  { %4120 = vmatmul.mubr.msk.bf16.vlgmr.msra.gmra.mxu1 %vm105_vm2, %v55_v43  ;;  %v535_v4 = vsel %vm109_vm1, %v512_v2, 0 }
  0x95   :  { %463 = vmatpush1.bf16.msra.mxu1 %v320_v48  ;;  %480 = vmatprep.mubr.bf16.mxu1 %v4359_v11 }
  0x96   :  { %4127 = vmatprep.subr.msk.bf16.mxu1 %vm109_vm1, %v509_v52  ;;  %v713_v54 = vpop.permute.xlu0 %712  ;;  %v715_v55 = vpop.permute.xlu1 %714 }
  0x97   :  { %v729_v7 = vsel %vm728_vm4, %v713_v54, %v715_v55 }
  0x98   :  { %4122 = vmatmul.mubr.msk.bf16.vlgmr.msra.gmra.mxu0 %vm105_vm2, %v55_v43  ;;  %v740_v9 = vsel %vm109_vm1, %v729_v7, 0 }
  0x99   :  { %555 = vmatpush1.bf16.msra.mxu0 %v517_v53  ;;  %572 = vmatprep.mubr.bf16.mxu0 %v4359_v11  ;;  %v2050_v53 = vld [vmem:[%s5377_s3] sm:$0xff] }
  0x9a   :  { %4129 = vmatprep.subr.msk.bf16.mxu0 %vm109_vm1, %v511_v57  ;;  %v717_v59 = vpop.permute.xlu0 %716  ;;  %v719_v60 = vpop.permute.xlu1 %718  ;;  %2053 = vperm.xlu0 %4330, %v2050_v53  }
  0x9b   :  { %v730_v3 = vsel %vm728_vm4, %v715_v55, %v717_v59  ;;  %v731_v13 = vsel %vm728_vm4, %v717_v59, %v719_v60 }
  0x9c   :  { %4124 = vmatmul.mubr.msk.bf16.vlgmr.msra.gmra.mxu1 %vm105_vm2, %v55_v43  ;;  %v746_v15 = vsel %vm109_vm1, %v731_v13, 0 }
  0x9d   :  { %596 = vmatpush1.bf16.msra.mxu1 %v523_v58  ;;  %613 = vmatprep.mubr.bf16.mxu1 %v4359_v11 }
  0x9e   :  { %4131 = vmatprep.subr.msk.bf16.mxu1 %vm109_vm1, %v504_v50  ;;  %v721_v0 = vpop.permute.xlu0 %720  ;;  %v723_v1 = vpop.permute.xlu1 %722 }
  0x9f   :  { %v732_v8 = vsel %vm728_vm4, %v719_v60, %v721_v0  ;;  %v733_v18 = vsel %vm728_vm4, %v721_v0, %v723_v1 }
  0xa0   :  { %4126 = vmatmul.mubr.msk.bf16.vlgmr.msra.gmra.mxu0 %vm105_vm2, %v57_v62  ;;  %v752_v20 = vsel %vm109_vm1, %v733_v18, 0  ;;  %v61_v18 = vld [vmem:[%s5376_s2 + $0x18] sm:$0xf] }
  0xa1   :  { %637 = vmatpush1.bf16.msra.mxu0 %v529_v63  ;;  %654 = vmatprep.mubr.bf16.mxu0 %v4359_v11 }
  0xa2   :  { %4133 = vmatprep.subr.msk.bf16.mxu0 %vm109_vm1, %v730_v3  ;;  %v725_v5 = vpop.permute.xlu0 %724  ;;  %v727_v6 = vpop.permute.xlu1 %726 }
  0xa3   :  { %v734_v14 = vsel %vm728_vm4, %v723_v1, %v725_v5  ;;  %v735_v23 = vsel %vm728_vm4, %v725_v5, %v727_v6 }
  0xa4   :  { %4128 = vmatmul.mubr.msk.bf16.vlgmr.msra.gmra.mxu1 %vm105_vm2, %v57_v62  ;;  %v758_v25 = vsel %vm109_vm1, %v735_v23, 0 }
  0xa5   :  { %678 = vmatpush1.bf16.msra.mxu1 %v535_v4  ;;  %695 = vmatprep.mubr.bf16.mxu1 %v4359_v11 }
  0xa6   :  { %4135 = vmatprep.subr.msk.bf16.mxu1 %vm109_vm1, %v732_v8  ;;  %v936_v10 = vpop.permute.xlu0 %935  ;;  %v938_v12 = vpop.permute.xlu1 %937 }
  0xa7   :  { %v952_v28 = vsel %vm951_vm5, %v936_v10, %v938_v12 }
  0xa8   :  { %4130 = vmatmul.mubr.msk.bf16.vlgmr.msra.gmra.mxu0 %vm105_vm2, %v57_v62  ;;  %v963_v30 = vsel %vm109_vm1, %v952_v28, 0 }
  0xa9   :  { %778 = vmatpush1.bf16.msra.mxu0 %v740_v9  ;;  %795 = vmatprep.mubr.bf16.mxu0 %v4359_v11 }
  0xaa   :  { %4137 = vmatprep.subr.msk.bf16.mxu0 %vm109_vm1, %v734_v14  ;;  %v940_v16 = vpop.permute.xlu0 %939  ;;  %v942_v17 = vpop.permute.xlu1 %941 }
  0xab   :  { %v953_v24 = vsel %vm951_vm5, %v938_v12, %v940_v16  ;;  %v954_v33 = vsel %vm951_vm5, %v940_v16, %v942_v17 }
  0xac   :  { %4132 = vmatmul.mubr.msk.bf16.vlgmr.msra.gmra.mxu1 %vm105_vm2, %v57_v62  ;;  %v969_v35 = vsel %vm109_vm1, %v954_v33, 0 }
  0xad   :  { %819 = vmatpush1.bf16.msra.mxu1 %v746_v15  ;;  %836 = vmatprep.mubr.bf16.mxu1 %v4359_v11 }
  0xae   :  { %4139 = vmatprep.subr.msk.bf16.mxu1 %vm109_vm1, %v727_v6  ;;  %v944_v21 = vpop.permute.xlu0 %943  ;;  %v946_v22 = vpop.permute.xlu1 %945 }
  0xaf   :  { %v955_v29 = vsel %vm951_vm5, %v942_v17, %v944_v21  ;;  %v956_v38 = vsel %vm951_vm5, %v944_v21, %v946_v22 }
  0xb0   :  { %4134 = vmatmul.mubr.msk.bf16.vlgmr.msra.gmra.mxu0 %vm105_vm2, %v58_v19  ;;  %v975_v40 = vsel %vm109_vm1, %v956_v38, 0 }
  0xb1   :  { %860 = vmatpush1.bf16.msra.mxu0 %v752_v20  ;;  %877 = vmatprep.mubr.bf16.mxu0 %v4359_v11 }
  0xb2   :  { %4141 = vmatprep.subr.msk.bf16.mxu0 %vm109_vm1, %v953_v24  ;;  %v948_v26 = vpop.permute.xlu0 %947  ;;  %v950_v27 = vpop.permute.xlu1 %949 }
  0xb3   :  { %v957_v34 = vsel %vm951_vm5, %v946_v22, %v948_v26  ;;  %v958_v43 = vsel %vm951_vm5, %v948_v26, %v950_v27 }
  0xb4   :  { %4136 = vmatmul.mubr.msk.bf16.vlgmr.msra.gmra.mxu1 %vm105_vm2, %v58_v19  ;;  %v981_v45 = vsel %vm109_vm1, %v958_v43, 0 }
  0xb5   :  { %901 = vmatpush1.bf16.msra.mxu1 %v758_v25  ;;  %918 = vmatprep.mubr.bf16.mxu1 %v4359_v11 }
  0xb6   :  { %4143 = vmatprep.subr.msk.bf16.mxu1 %vm109_vm1, %v955_v29  ;;  %v1159_v31 = vpop.permute.xlu0 %1158  ;;  %v1161_v32 = vpop.permute.xlu1 %1160 }
  0xb7   :  { %v1175_v48 = vsel %vm1174_vm6, %v1159_v31, %v1161_v32 }
  0xb8   :  { %4138 = vmatmul.mubr.msk.bf16.vlgmr.msra.gmra.mxu0 %vm105_vm2, %v58_v19  ;;  %v1186_v50 = vsel %vm109_vm1, %v1175_v48, 0 }
  0xb9   :  { %1001 = vmatpush1.bf16.msra.mxu0 %v963_v30  ;;  %1018 = vmatprep.mubr.bf16.mxu0 %v4359_v11 }
  0xba   :  { %4145 = vmatprep.subr.msk.bf16.mxu0 %vm109_vm1, %v957_v34  ;;  %v1163_v36 = vpop.permute.xlu0 %1162  ;;  %v1165_v37 = vpop.permute.xlu1 %1164 }
  0xbb   :  { %v1176_v44 = vsel %vm1174_vm6, %v1161_v32, %v1163_v36  ;;  %v1177_v54 = vsel %vm1174_vm6, %v1163_v36, %v1165_v37 }
  0xbc   :  { %4140 = vmatmul.mubr.msk.bf16.vlgmr.msra.gmra.mxu1 %vm105_vm2, %v58_v19  ;;  %v1192_v57 = vsel %vm109_vm1, %v1177_v54, 0  ;;  %v63_v54 = vld [vmem:[%s5376_s2 + $0x20] sm:$0xf] }
  0xbd   :  { %1042 = vmatpush1.bf16.msra.mxu1 %v969_v35  ;;  %1059 = vmatprep.mubr.bf16.mxu1 %v4359_v11 }
  0xbe   :  { %4147 = vmatprep.subr.msk.bf16.mxu1 %vm109_vm1, %v950_v27  ;;  %v1167_v41 = vpop.permute.xlu0 %1166  ;;  %v1169_v42 = vpop.permute.xlu1 %1168 }
  0xbf   :  { %v1178_v49 = vsel %vm1174_vm6, %v1165_v37, %v1167_v41  ;;  %v1179_v60 = vsel %vm1174_vm6, %v1167_v41, %v1169_v42  ;;  %v62_v37 = vld [vmem:[%s5376_s2 + $0x1c] sm:$0xf] }
  0xc0   :  { %4142 = vmatmul.mubr.msk.bf16.vlgmr.msra.gmra.mxu0 %vm105_vm2, %v59_v39  ;;  %v1198_v62 = vsel %vm109_vm1, %v1179_v60, 0 }
  0xc1   :  { %1083 = vmatpush1.bf16.msra.mxu0 %v975_v40  ;;  %1100 = vmatprep.mubr.bf16.mxu0 %v4359_v11 }
  0xc2   :  { %4149 = vmatprep.subr.msk.bf16.mxu0 %vm109_vm1, %v1176_v44  ;;  %v1171_v46 = vpop.permute.xlu0 %1170  ;;  %v1173_v47 = vpop.permute.xlu1 %1172 }
  0xc3   :  { %v1180_v55 = vsel %vm1174_vm6, %v1169_v42, %v1171_v46  ;;  %v1181_v1 = vsel %vm1174_vm6, %v1171_v46, %v1173_v47 }
  0xc4   :  { %4144 = vmatmul.mubr.msk.bf16.vlgmr.msra.gmra.mxu1 %vm105_vm2, %v59_v39  ;;  %v1204_v3 = vsel %vm109_vm1, %v1181_v1, 0 }
  0xc5   :  { %1124 = vmatpush1.bf16.msra.mxu1 %v981_v45  ;;  %1141 = vmatprep.mubr.bf16.mxu1 %v4359_v11 }
  0xc6   :  { %4151 = vmatprep.subr.msk.bf16.mxu1 %vm109_vm1, %v1178_v49  ;;  %v1382_v51 = vpop.permute.xlu0 %1381  ;;  %v1384_v52 = vpop.permute.xlu1 %1383 }
  0xc7   :  { %v1398_v6 = vsel %vm1397_vm7, %v1382_v51, %v1384_v52 }
  0xc8   :  { %4146 = vmatmul.mubr.msk.bf16.vlgmr.msra.gmra.mxu0 %vm105_vm2, %v59_v39  ;;  %v1409_v8 = vsel %vm109_vm1, %v1398_v6, 0 }
  0xc9   :  { %1224 = vmatpush1.bf16.msra.mxu0 %v1186_v50  ;;  %1241 = vmatprep.mubr.bf16.mxu0 %v4359_v11 }
  0xca   :  { %4153 = vmatprep.subr.msk.bf16.mxu0 %vm109_vm1, %v1180_v55  ;;  %v1386_v58 = vpop.permute.xlu0 %1385  ;;  %v1388_v59 = vpop.permute.xlu1 %1387 }
  0xcb   :  { %v1399_v2 = vsel %vm1397_vm7, %v1384_v52, %v1386_v58  ;;  %v1400_v12 = vsel %vm1397_vm7, %v1386_v58, %v1388_v59 }
  0xcc   :  { %4148 = vmatmul.mubr.msk.bf16.vlgmr.msra.gmra.mxu1 %vm105_vm2, %v59_v39  ;;  %v1415_v14 = vsel %vm109_vm1, %v1400_v12, 0 }
  0xcd   :  { %1265 = vmatpush1.bf16.msra.mxu1 %v1192_v57  ;;  %1282 = vmatprep.mubr.bf16.mxu1 %v4359_v11 }
  0xce   :  { %4155 = vmatprep.subr.msk.bf16.mxu1 %vm109_vm1, %v1173_v47  ;;  %v1390_v63 = vpop.permute.xlu0 %1389  ;;  %v1392_v0 = vpop.permute.xlu1 %1391 }
  0xcf   :  { %v1401_v7 = vsel %vm1397_vm7, %v1388_v59, %v1390_v63  ;;  %v1402_v17 = vsel %vm1397_vm7, %v1390_v63, %v1392_v0 }
  0xd0   :  { %4150 = vmatmul.mubr.msk.bf16.vlgmr.msra.gmra.mxu0 %vm105_vm2, %v60_v61  ;;  %v1421_v19 = vsel %vm109_vm1, %v1402_v17, 0 }
  0xd1   :  { %1306 = vmatpush1.bf16.msra.mxu0 %v1198_v62  ;;  %1323 = vmatprep.mubr.bf16.mxu0 %v4359_v11 }
  0xd2   :  { %4157 = vmatprep.subr.msk.bf16.mxu0 %vm109_vm1, %v1399_v2  ;;  %v1394_v4 = vpop.permute.xlu0 %1393  ;;  %v1396_v5 = vpop.permute.xlu1 %1395 }
  0xd3   :  { %v1403_v13 = vsel %vm1397_vm7, %v1392_v0, %v1394_v4  ;;  %v1404_v22 = vsel %vm1397_vm7, %v1394_v4, %v1396_v5 }
  0xd4   :  { %4152 = vmatmul.mubr.msk.bf16.vlgmr.msra.gmra.mxu1 %vm105_vm2, %v60_v61  ;;  %v1427_v24 = vsel %vm109_vm1, %v1404_v22, 0 }
  0xd5   :  { %1347 = vmatpush1.bf16.msra.mxu1 %v1204_v3  ;;  %1364 = vmatprep.mubr.bf16.mxu1 %v4359_v11 }
  0xd6   :  { %4159 = vmatprep.subr.msk.bf16.mxu1 %vm109_vm1, %v1401_v7  ;;  %v1605_v9 = vpop.permute.xlu0 %1604  ;;  %v1607_v10 = vpop.permute.xlu1 %1606 }
  0xd7   :  { %v1621_v27 = vsel %vm1620_vm8, %v1605_v9, %v1607_v10 }
  0xd8   :  { %4154 = vmatmul.mubr.msk.bf16.vlgmr.msra.gmra.mxu0 %vm105_vm2, %v60_v61  ;;  %v1632_v29 = vsel %vm109_vm1, %v1621_v27, 0 }
  0xd9   :  { %1447 = vmatpush1.bf16.msra.mxu0 %v1409_v8  ;;  %1464 = vmatprep.mubr.bf16.mxu0 %v4359_v11 }
  0xda   :  { %4161 = vmatprep.subr.msk.bf16.mxu0 %vm109_vm1, %v1403_v13  ;;  %v1609_v15 = vpop.permute.xlu0 %1608  ;;  %v1611_v16 = vpop.permute.xlu1 %1610 }
  0xdb   :  { %v1622_v23 = vsel %vm1620_vm8, %v1607_v10, %v1609_v15  ;;  %v1623_v31 = vsel %vm1620_vm8, %v1609_v15, %v1611_v16 }
  0xdc   :  { %4156 = vmatmul.mubr.msk.bf16.vlgmr.msra.gmra.mxu1 %vm105_vm2, %v60_v61  ;;  %v1638_v34 = vsel %vm109_vm1, %v1623_v31, 0 }
  0xdd   :  { %1488 = vmatpush1.bf16.msra.mxu1 %v1415_v14  ;;  %1505 = vmatprep.mubr.bf16.mxu1 %v4359_v11 }
  0xde   :  { %4163 = vmatprep.subr.msk.bf16.mxu1 %vm109_vm1, %v1396_v5  ;;  %v1613_v20 = vpop.permute.xlu0 %1612  ;;  %v1615_v21 = vpop.permute.xlu1 %1614 }
  0xdf   :  { %v1624_v28 = vsel %vm1620_vm8, %v1611_v16, %v1613_v20  ;;  %v1625_v36 = vsel %vm1620_vm8, %v1613_v20, %v1615_v21 }
  0xe0   :  { %4158 = vmatmul.mubr.msk.bf16.vlgmr.msra.gmra.mxu0 %vm105_vm2, %v61_v18  ;;  %v1644_v38 = vsel %vm109_vm1, %v1625_v36, 0 }
  0xe1   :  { %1529 = vmatpush1.bf16.msra.mxu0 %v1421_v19  ;;  %1546 = vmatprep.mubr.bf16.mxu0 %v4359_v11 }
  0xe2   :  { %4165 = vmatprep.subr.msk.bf16.mxu0 %vm109_vm1, %v1622_v23  ;;  %v1617_v25 = vpop.permute.xlu0 %1616  ;;  %v1619_v26 = vpop.permute.xlu1 %1618 }
  0xe3   :  { %v1626_v32 = vsel %vm1620_vm8, %v1615_v21, %v1617_v25  ;;  %v1627_v41 = vsel %vm1620_vm8, %v1617_v25, %v1619_v26 }
  0xe4   :  { %4160 = vmatmul.mubr.msk.bf16.vlgmr.msra.gmra.mxu1 %vm105_vm2, %v61_v18  ;;  %v1650_v43 = vsel %vm109_vm1, %v1627_v41, 0 }
  0xe5   :  { %1570 = vmatpush1.bf16.msra.mxu1 %v1427_v24  ;;  %1587 = vmatprep.mubr.bf16.mxu1 %v4359_v11 }
  0xe6   :  { %4167 = vmatprep.subr.msk.bf16.mxu1 %vm109_vm1, %v1624_v28  ;;  %v1828_v30 = vpop.permute.xlu0 %1827  ;;  %v1830_v33 = vpop.permute.xlu1 %1829 }
  0xe7   :  { %v1844_v44 = vsel %vm1843_vm9, %v1828_v30, %v1830_v33 }
  0xe8   :  { %4162 = vmatmul.mubr.msk.bf16.vlgmr.msra.gmra.mxu0 %vm105_vm2, %v61_v18  ;;  %v1855_v48 = vsel %vm109_vm1, %v1844_v44, 0 }
  0xe9   :  { %1670 = vmatpush1.bf16.msra.mxu0 %v1632_v29  ;;  %1687 = vmatprep.mubr.bf16.mxu0 %v4359_v11 }
  0xea   :  { %4169 = vmatprep.subr.msk.bf16.mxu0 %vm109_vm1, %v1626_v32  ;;  %v1832_v35 = vpop.permute.xlu0 %1831  ;;  %v1834_v39 = vpop.permute.xlu1 %1833 }
  0xeb   :  { %v1845_v42 = vsel %vm1843_vm9, %v1830_v33, %v1832_v35  ;;  %v1846_v49 = vsel %vm1843_vm9, %v1832_v35, %v1834_v39 }
  0xec   :  { %4164 = vmatmul.mubr.msk.bf16.vlgmr.msra.gmra.mxu1 %vm105_vm2, %v61_v18  ;;  %v1861_v51 = vsel %vm109_vm1, %v1846_v49, 0 }
  0xed   :  { %1711 = vmatpush1.bf16.msra.mxu1 %v1638_v34  ;;  %1728 = vmatprep.mubr.bf16.mxu1 %v4359_v11 }
  0xee   :  { %4171 = vmatprep.subr.msk.bf16.mxu1 %vm109_vm1, %v1619_v26  ;;  %v1836_v40 = vpop.permute.xlu0 %1835 }
  0xef   :  { %v1847_v45 = vsel %vm1843_vm9, %v1834_v39, %v1836_v40  ;;  %v1838_v46 = vpop.permute.xlu1 %1837 }
  0xf0   :  { %4166 = vmatmul.mubr.msk.bf16.vlgmr.msra.gmra.mxu0 %vm105_vm2, %v62_v37  ;;  %v1848_v52 = vsel %vm1843_vm9, %v1836_v40, %v1838_v46 }
  0xf1   :  { %1752 = vmatpush1.bf16.msra.mxu0 %v1644_v38  ;;  %1769 = vmatprep.mubr.bf16.mxu0 %v4359_v11  ;;  %v1867_v55 = vsel %vm109_vm1, %v1848_v52, 0 }
  0xf2   :  { %4173 = vmatprep.subr.msk.bf16.mxu0 %vm109_vm1, %v1845_v42 }
  0xf4   :  { %4168 = vmatmul.mubr.msk.bf16.vlgmr.msra.gmra.mxu1 %vm105_vm2, %v62_v37  ;;  %v1840_v47 = vpop.permute.xlu0 %1839  ;;  %v1842_v53 = vpop.permute.xlu1 %1841 }
  0xf5   :  { %1793 = vmatpush1.bf16.msra.mxu1 %v1650_v43  ;;  %1810 = vmatprep.mubr.bf16.mxu1 %v4359_v11  ;;  %v1849_v50 = vsel %vm1843_vm9, %v1838_v46, %v1840_v47  ;;  %v1850_v56 = vsel %vm1843_vm9, %v1840_v47, %v1842_v53 }
  0xf6   :  { %4175 = vmatprep.subr.msk.bf16.mxu1 %vm109_vm1, %v1847_v45  ;;  %v1873_v57 = vsel %vm109_vm1, %v1850_v56, 0 }
  0xf8   :  { %4170 = vmatmul.mubr.msk.bf16.vlgmr.msra.gmra.mxu0 %vm105_vm2, %v62_v37 }
  0xf9   :  { %1893 = vmatpush1.bf16.msra.mxu0 %v1855_v48  ;;  %1910 = vmatprep.mubr.bf16.mxu0 %v4359_v11 }
  0xfa   :  { %4177 = vmatprep.subr.msk.bf16.mxu0 %vm109_vm1, %v1849_v50 }
  0xfc   :  { %4172 = vmatmul.mubr.msk.bf16.vlgmr.msra.gmra.mxu1 %vm105_vm2, %v62_v37 }
  0xfd   :  { %1934 = vmatpush1.bf16.msra.mxu1 %v1861_v51  ;;  %1951 = vmatprep.mubr.bf16.mxu1 %v4359_v11 }
  0xfe   :  { %4179 = vmatprep.subr.msk.bf16.mxu1 %vm109_vm1, %v1842_v53 }
 0x100   :  { %4174 = vmatmul.mubr.msk.bf16.vlgmr.msra.gmra.mxu0 %vm105_vm2, %v63_v54 }
 0x101   :  { %1975 = vmatpush1.bf16.msra.mxu0 %v1867_v55  ;;  %1992 = vmatprep.mubr.bf16.mxu0 %v4359_v11 }
 0x104   :  { %4176 = vmatmul.mubr.msk.bf16.vlgmr.msra.gmra.mxu1 %vm105_vm2, %v63_v54 }
 0x105   :  { %2016 = vmatpush1.bf16.msra.mxu1 %v1873_v57  ;;  %2033 = vmatprep.mubr.bf16.mxu1 %v4359_v11 }
 0x108   :  { %4178 = vmatmul.mubr.msk.bf16.vlgmr.msra.gmra.mxu0 %vm105_vm2, %v63_v54 }
 0x109   :  { %2233 = vmatprep.mubr.bf16.mxu0 %v4359_v11 }
 0x10c   :  { %4180 = vmatmul.mubr.msk.bf16.vlgmr.msra.gmra.mxu1 %vm105_vm2, %v63_v54 }
 0x10d   :  { %2274 = vmatprep.mubr.bf16.mxu1 %v4359_v11 }
 0x140   :  { %v168_v58 = vpop.f32.mrf.mxu0 }
 0x142   :  { %v170_v59 = vpop.f32.mrf.mxu0 }
 0x144   :  { %v172_v60 = vpop.f32.mrf.mxu0  ;;  %v209_v61 = vpop.f32.mrf.mxu1 }
 0x146   :  { %v173_v62 = vpop.f32.mrf.mxu0  ;;  %v211_v63 = vpop.f32.mrf.mxu1 }
 0x148   :  { %v213_v0 = vpop.f32.mrf.mxu1  ;;  %v250_v1 = vpop.f32.mrf.mxu0 }
 0x14a   :  { %v214_v2 = vpop.f32.mrf.mxu1  ;;  %v252_v3 = vpop.f32.mrf.mxu0 }
 0x14c   :  { %v254_v4 = vpop.f32.mrf.mxu0  ;;  %v291_v5 = vpop.f32.mrf.mxu1 }
 0x14e   :  { %v255_v6 = vpop.f32.mrf.mxu0  ;;  %v293_v7 = vpop.f32.mrf.mxu1 }
 0x150   :  { %v295_v8 = vpop.f32.mrf.mxu1  ;;  %v359_v9 = vpop.f32.mrf.mxu0 }
 0x151   :  { %v360_v10 = vadd.f32 %v359_v9, %v168_v58 }
 0x152   :  { %v296_v12 = vpop.f32.mrf.mxu1  ;;  %v361_v13 = vpop.f32.mrf.mxu0 }
 0x153   :  { %v362_v14 = vadd.f32 %v361_v13, %v170_v59 }
 0x154   :  { %v363_v15 = vpop.f32.mrf.mxu0  ;;  %v400_v16 = vpop.f32.mrf.mxu1 }
 0x155   :  { %v401_v17 = vadd.f32 %v400_v16, %v209_v61 }
 0x156   :  { %v364_v18 = vpop.f32.mrf.mxu0  ;;  %v402_v19 = vpop.f32.mrf.mxu1 }
 0x157   :  { %v403_v20 = vadd.f32 %v402_v19, %v211_v63 }
 0x158   :  { %v404_v21 = vpop.f32.mrf.mxu1  ;;  %v441_v22 = vpop.f32.mrf.mxu0 }
 0x159   :  { %v442_v23 = vadd.f32 %v441_v22, %v250_v1 }
 0x15a   :  { %v405_v24 = vpop.f32.mrf.mxu1  ;;  %v443_v25 = vpop.f32.mrf.mxu0 }
 0x15b   :  { %v444_v26 = vadd.f32 %v443_v25, %v252_v3 }
 0x15c   :  { %v445_v27 = vpop.f32.mrf.mxu0  ;;  %v482_v28 = vpop.f32.mrf.mxu1 }
 0x15d   :  { %v483_v29 = vadd.f32 %v482_v28, %v291_v5 }
 0x15e   :  { %v446_v30 = vpop.f32.mrf.mxu0  ;;  %v484_v31 = vpop.f32.mrf.mxu1 }
 0x15f   :  { %v485_v32 = vadd.f32 %v484_v31, %v293_v7 }
 0x160   :  { %v486_v33 = vpop.f32.mrf.mxu1  ;;  %v574_v34 = vpop.f32.mrf.mxu0 }
 0x161   :  { %v704_v35 = vadd.f32 %v574_v34, %v360_v10 }
 0x162   :  { %v487_v36 = vpop.f32.mrf.mxu1  ;;  %v576_v37 = vpop.f32.mrf.mxu0 }
 0x163   :  { %v705_v38 = vadd.f32 %v576_v37, %v362_v14 }
 0x164   :  { %v578_v39 = vpop.f32.mrf.mxu0  ;;  %v615_v40 = vpop.f32.mrf.mxu1 }
 0x165   :  { %v706_v41 = vadd.f32 %v615_v40, %v401_v17 }
 0x166   :  { %v579_v42 = vpop.f32.mrf.mxu0  ;;  %v617_v43 = vpop.f32.mrf.mxu1 }
 0x167   :  { %v707_v44 = vadd.f32 %v617_v43, %v403_v20 }
 0x168   :  { %v619_v45 = vpop.f32.mrf.mxu1  ;;  %v656_v46 = vpop.f32.mrf.mxu0 }
 0x169   :  { %v708_v47 = vadd.f32 %v656_v46, %v442_v23 }
 0x16a   :  { %v620_v48 = vpop.f32.mrf.mxu1  ;;  %v658_v49 = vpop.f32.mrf.mxu0 }
 0x16b   :  { %v709_v50 = vadd.f32 %v658_v49, %v444_v26 }
 0x16c   :  { %v660_v51 = vpop.f32.mrf.mxu0  ;;  %v697_v52 = vpop.f32.mrf.mxu1 }
 0x16d   :  { %v710_v53 = vadd.f32 %v697_v52, %v483_v29 }
 0x16e   :  { %v661_v54 = vpop.f32.mrf.mxu0  ;;  %v699_v55 = vpop.f32.mrf.mxu1 }
 0x16f   :  { %v711_v56 = vadd.f32 %v699_v55, %v485_v32 }
 0x170   :  { %v701_v57 = vpop.f32.mrf.mxu1  ;;  %v797_v58 = vpop.f32.mrf.mxu0 }
 0x171   :  { %v4818_v59 = vadd.f32 %v797_v58, %v704_v35 }
 0x172   :  { %v702_v60 = vpop.f32.mrf.mxu1  ;;  %v799_v61 = vpop.f32.mrf.mxu0 }
 0x173   :  { %v4820_v62 = vadd.f32 %v799_v61, %v705_v38 }
 0x174   :  { %v801_v63 = vpop.f32.mrf.mxu0  ;;  %v838_v0 = vpop.f32.mrf.mxu1 }
 0x175   :  { %v4822_v1 = vadd.f32 %v838_v0, %v706_v41 }
 0x176   :  { %v802_v2 = vpop.f32.mrf.mxu0  ;;  %v840_v3 = vpop.f32.mrf.mxu1 }
 0x177   :  { %v4824_v4 = vadd.f32 %v840_v3, %v707_v44 }
 0x178   :  { %v842_v5 = vpop.f32.mrf.mxu1  ;;  %v879_v6 = vpop.f32.mrf.mxu0 }
 0x179   :  { %v4826_v7 = vadd.f32 %v879_v6, %v708_v47 }
 0x17a   :  { %v843_v8 = vpop.f32.mrf.mxu1  ;;  %v881_v9 = vpop.f32.mrf.mxu0 }
 0x17b   :  { %v4828_v10 = vadd.f32 %v881_v9, %v709_v50 }
 0x17c   :  { %v883_v12 = vpop.f32.mrf.mxu0  ;;  %v920_v13 = vpop.f32.mrf.mxu1 }
 0x17d   :  { %v4830_v14 = vadd.f32 %v920_v13, %v710_v53 }
 0x17e   :  { %v884_v15 = vpop.f32.mrf.mxu0  ;;  %v922_v16 = vpop.f32.mrf.mxu1 }
 0x17f   :  { %v4832_v17 = vadd.f32 %v922_v16, %v711_v56  ;;  %v2088_v16 = vlaneseq }
 0x180   :  { %v924_v18 = vpop.f32.mrf.mxu1  ;;  %v1020_v19 = vpop.f32.mrf.mxu0 }
 0x182   :  { %v925_v20 = vpop.f32.mrf.mxu1  ;;  %v1022_v21 = vpop.f32.mrf.mxu0 }
 0x184   :  { %v1024_v22 = vpop.f32.mrf.mxu0  ;;  %v4834_v23 = vpop.f32.mrf.mxu1 }
 0x186   :  { %v1025_v24 = vpop.f32.mrf.mxu0  ;;  %v4836_v25 = vpop.f32.mrf.mxu1 }
 0x188   :  { %v1065_v26 = vpop.f32.mrf.mxu1  ;;  %v4838_v27 = vpop.f32.mrf.mxu0 }
 0x189   :  { %v4866_v26 = vshrl.u32 %v2088_v16, 7 }
 0x18a   :  { %v1066_v28 = vpop.f32.mrf.mxu1  ;;  %v4840_v29 = vpop.f32.mrf.mxu0 }
 0x18b   :  { %v1150_v28 = vadd.f32 %v1020_v19, %v4818_v59  ;;  %v4881_v59 = vld [vmem:[%s5375_s1] sm:$0xff]  ;;  %v2106_v16 = vsub.s32 4, %v4866_v26 }
 0x18c   :  { %v1106_v30 = vpop.f32.mrf.mxu0  ;;  %v4842_v31 = vpop.f32.mrf.mxu1 }
 0x18e   :  { %v1107_v32 = vpop.f32.mrf.mxu0  ;;  %v4844_v33 = vpop.f32.mrf.mxu1 }
 0x190   :  { %v1147_v34 = vpop.f32.mrf.mxu1  ;;  %v1243_v35 = vpop.f32.mrf.mxu0 }
 0x191   :  { %v1151_v34 = vadd.f32 %v1022_v21, %v4820_v62  ;;  %v2098_v21 = vsub.s32 2, %v4866_v26 }
 0x192   :  { %v1148_v36 = vpop.f32.mrf.mxu1  ;;  %v1245_v37 = vpop.f32.mrf.mxu0 }
 0x193   :  { %v1373_v36 = vadd.f32 %v1243_v35, %v1150_v28  ;;  %v2102_v35 = vsub.s32 3, %v4866_v26 }
 0x194   :  { %v1247_v38 = vpop.f32.mrf.mxu0  ;;  %v1284_v39 = vpop.f32.mrf.mxu1 }
 0x196   :  { %v1248_v40 = vpop.f32.mrf.mxu0  ;;  %v4846_v41 = vpop.f32.mrf.mxu1 }
 0x198   :  { %v1288_v42 = vpop.f32.mrf.mxu1  ;;  %v4848_v43 = vpop.f32.mrf.mxu0 }
 0x199   :  { %v2090_v42 = vsub.s32 0, %v4866_v26 }
 0x19a   :  { %v1289_v44 = vpop.f32.mrf.mxu1  ;;  %v4850_v45 = vpop.f32.mrf.mxu0 }
 0x19b   :  { %v2094_v44 = vsub.s32 1, %v4866_v26 }
 0x19c   :  { %v1329_v46 = vpop.f32.mrf.mxu0  ;;  %v4852_v47 = vpop.f32.mrf.mxu1 }
 0x19d   :  { %v1152_v46 = vadd.f32 %v4834_v23, %v4822_v1  ;;  %v4889_v23 = vpop.permute.xlu0 %2053 }
 0x19e   :  { %v1330_v48 = vpop.f32.mrf.mxu0  ;;  %v4854_v49 = vpop.f32.mrf.mxu1 }
 0x19f   :  { %v1374_v48 = vadd.f32 %v1245_v37, %v1151_v34  ;;  %v2110_v34 = vsub.s32 5, %v4866_v26 }
 0x1a0   :  { %v1370_v50 = vpop.f32.mrf.mxu1  ;;  %v1466_v51 = vpop.f32.mrf.mxu0 }
 0x1a1   :  { %v1596_v50 = vadd.f32 %v1466_v51, %v1373_v36 }
 0x1a2   :  { %v1371_v52 = vpop.f32.mrf.mxu1  ;;  %v1468_v53 = vpop.f32.mrf.mxu0 }
 0x1a3   :  { %v1153_v52 = vadd.f32 %v4836_v25, %v4824_v4  ;;  %v1154_v4 = vadd.f32 %v4838_v27, %v4826_v7  ;;  %v1156_v7 = vadd.f32 %v4842_v31, %v4830_v14 }
 0x1a4   :  { %v1470_v54 = vpop.f32.mrf.mxu0  ;;  %v1507_v55 = vpop.f32.mrf.mxu1 }
 0x1a5   :  { %v1375_v54 = vadd.f32 %v1284_v39, %v1152_v46  ;;  %v1377_v27 = vadd.f32 %v4848_v43, %v1154_v4 }
 0x1a6   :  { %v1471_v56 = vpop.f32.mrf.mxu0  ;;  %v1509_v57 = vpop.f32.mrf.mxu1 }
 0x1a7   :  { %v1597_v56 = vadd.f32 %v1468_v53, %v1374_v48  ;;  %v2099_v53 = vrot.slane %v4881_v59, %v2098_v21 }
 0x1a8   :  { %v1511_v58 = vpop.f32.mrf.mxu1  ;;  %v4856_v60 = vpop.f32.mrf.mxu0 }
 0x1a9   :  { %v2091_v58 = vrot.slane %v4881_v59, %v2090_v42  ;;  %v1157_v42 = vadd.f32 %v4844_v33, %v4832_v17  ;;  %v1600_v14 = vadd.f32 %v4856_v60, %v1377_v27 }
 0x1aa   :  { %v1512_v61 = vpop.f32.mrf.mxu1  ;;  %v4858_v63 = vpop.f32.mrf.mxu0 }
 0x1ab   :  { %v2095_v61 = vrot.slane %v4881_v59, %v2094_v44 }
 0x1ac   :  { %v1552_v0 = vpop.f32.mrf.mxu0  ;;  %v4860_v2 = vpop.f32.mrf.mxu1 }
 0x1ad   :  { %v1376_v0 = vadd.f32 %v4846_v41, %v1153_v52 }
 0x1ae   :  { %v1553_v3 = vpop.f32.mrf.mxu0  ;;  %v4862_v5 = vpop.f32.mrf.mxu1 }
 0x1af   :  { %v1598_v3 = vadd.f32 %v1507_v55, %v1375_v54 }
 0x1b0   :  { %v1593_v6 = vpop.f32.mrf.mxu1  ;;  %v1689_v8 = vpop.f32.mrf.mxu0 }
 0x1b1   :  { %v1819_v1 = vadd.f32 %v1689_v8, %v1596_v50  ;;  %v4900_v8 = vrot.slane %v4881_v59, %v2102_v35  ;;  %v1380_v50 = vadd.f32 %v4854_v49, %v1157_v42 }
 0x1b2   :  { %v1594_v9 = vpop.f32.mrf.mxu1  ;;  %v1691_v12 = vpop.f32.mrf.mxu0 }
 0x1b3   :  { %v1820_v6 = vadd.f32 %v1691_v12, %v1597_v56  ;;  %v1155_v12 = vadd.f32 %v4840_v29, %v4828_v10  ;;  %v1379_v29 = vadd.f32 %v4852_v47, %v1156_v7  ;;  %v1603_v54 = vadd.f32 %v4862_v5, %v1380_v50 }
 0x1b4   :  { %v1693_v13 = vpop.f32.mrf.mxu0  ;;  %v1730_v15 = vpop.f32.mrf.mxu1 }
 0x1b5   :  { %v4894_v13 = vpop.permute.xlu1 %2067  ;;  %v1378_v10 = vadd.f32 %v4850_v45, %v1155_v12  ;;  %v1602_v17 = vadd.f32 %v4860_v2, %v1379_v29 }
 0x1b6   :  { %v1694_v18 = vpop.f32.mrf.mxu0  ;;  %v1732_v20 = vpop.f32.mrf.mxu1 }
 0x1b7   :  { %v1599_v18 = vadd.f32 %v1509_v57, %v1376_v0 }
 0x1b8   :  { %v1734_v22 = vpop.f32.mrf.mxu1  ;;  %v4864_v24 = vpop.f32.mrf.mxu0 }
 0x1b9   :  { %v1821_v22 = vadd.f32 %v1730_v15, %v1598_v3  ;;  %v1822_v36 = vadd.f32 %v1732_v20, %v1599_v18  ;;  %v1823_v33 = vadd.f32 %v4864_v24, %v1600_v14  ;;  %v2107_v18 = vrot.slane %v4881_v59, %v2106_v16 }
 0x1ba   :  { %v1735_v30 = vpop.f32.mrf.mxu1  ;;  %v4869_v32 = vpop.f32.mrf.mxu0  ;;  %v2111_v16 = vrot.slane %v4881_v59, %v2110_v34 }
 0x1bc   :  { %v1775_v38 = vpop.f32.mrf.mxu0  ;;  %v4872_v40 = vpop.f32.mrf.mxu1 }
 0x1bd   :  { %v1825_v49 = vadd.f32 %v4872_v40, %v1602_v17 }
 0x1be   :  { %v1776_v19 = vpop.f32.mrf.mxu0  ;;  %v4883_v62 = vpop.f32.mrf.mxu1 }
 0x1bf   :  { %v1601_v19 = vadd.f32 %v4858_v63, %v1378_v10 }
 0x1c0   :  { %v1816_v37 = vpop.f32.mrf.mxu1  ;;  %v1912_v51 = vpop.f32.mrf.mxu0 }
 0x1c1   :  { %v2042_v9 = vadd.f32 %v1912_v51, %v1819_v1  ;;  %v1824_v56 = vadd.f32 %v4869_v32, %v1601_v19  ;;  %v2114_v32 = vsub.s32 6, %v4866_v26 }
 0x1c2   :  { %v1817_v25 = vpop.f32.mrf.mxu1  ;;  %v1914_v39 = vpop.f32.mrf.mxu0 }
 0x1c3   :  { %v2043_v41 = vadd.f32 %v1914_v39, %v1820_v6  ;;  %v2056_v55 = vmul.f32 %v4889_v23, %v2042_v9 }
 0x1c4   :  { %v1916_v28 = vpop.f32.mrf.mxu0  ;;  %v1953_v30 = vpop.f32.mrf.mxu1 }
 0x1c5   :  { %v2057_v38 = vmul.f32 %v4889_v23, %v2043_v41  ;;  %v2070_v57 = vadd.f32 %v4894_v13, %v2056_v55  ;;  %v2044_v15 = vadd.f32 %v1953_v30, %v1821_v22  ;;  %v2118_v55 = vsub.s32 7, %v4866_v26 }
 0x1c6   :  { %v1917_v31 = vpop.f32.mrf.mxu0  ;;  %v1955_v43 = vpop.f32.mrf.mxu1 }
 0x1c7   :  { %v2071_v44 = vadd.f32 %v4894_v13, %v2057_v38  ;;  %v2078_v46 = vmax.f32 %v2070_v57, 0.0  ;;  %v2058_v20 = vmul.f32 %v4889_v23, %v2044_v15  ;;  %v2045_v48 = vadd.f32 %v1955_v43, %v1822_v36 }
 0x1c8   :  { %v1957_v45 = vpop.f32.mrf.mxu1  ;;  %v1994_v47 = vpop.f32.mrf.mxu0  ;;  %v2115_v57 = vrot.slane %v4881_v59, %v2114_v32  ;;  %v4367_v15 = vmov 0.0   ;;  %v2119_v31 = vrot.slane %v4881_v59, %v2118_v55 }
 0x1c9   :  { %v2079_v21 = vmax.f32 %v2071_v44, 0.0  ;;  %v2128_v60 = vmul.f32 %v2091_v58, %v2078_v46  ;;  %v2072_v35 = vadd.f32 %v4894_v13, %v2058_v20  ;;  %v2059_v52 = vmul.f32 %v4889_v23, %v2045_v48  ;;  %4087 = vst [vmem:[#allocation2 + $0x18] sm:$0xff] %v4367_v15  ;;  %4092 = vst [vmem:[#allocation2 + $0x38] sm:$0xff] %v4367_v15 }
 0x1ca   :  { %v2046_v1 = vadd.f32 %v1994_v47, %v1823_v33  ;;  %v1958_v63 = vpop.f32.mrf.mxu1  ;;  %v1996_v37 = vpop.f32.mrf.mxu0  ;;  %v1826_v58 = vadd.f32 %v4883_v62, %v1603_v54 }
 0x1cb   :  { %v2129_v2 = vmul.f32 %v2095_v61, %v2079_v21  ;;  %v4928_v51 = vpack.c.bf16 %v2128_v60, %v2128_v60  ;;  %v2080_v24 = vmax.f32 %v2072_v35, 0.0  ;;  %v2073_v0 = vadd.f32 %v4894_v13, %v2059_v52  ;;  %v65_v60 = vld [vmem:[%s5379_s5 + $0x4] sm:$0xf] }
 0x1cc   :  { %v2060_v3 = vmul.f32 %v4889_v23, %v2046_v1  ;;  %v2047_v6 = vadd.f32 %v1996_v37, %v1824_v56  ;;  %v1998_v9 = vpop.f32.mrf.mxu0  ;;  %v2035_v5 = vpop.f32.mrf.mxu1  ;;  %v4054_v1 = vld [vmem:[%s5380_s6] sm:$0xff] }
 0x1cd   :  { %v4934_v4 = vpack.c.bf16 %v2129_v2, %v2129_v2  ;;  %v2130_v40 = vmul.f32 %v2099_v53, %v2080_v24  ;;  %v2081_v25 = vmax.f32 %v2073_v0, 0.0  ;;  %v2048_v39 = vadd.f32 %v2035_v5, %v1825_v49  ;;  %2152 = vrot.lane.b32.xlu1 %v4928_v51, %s4358_s11  ;;  %v4066_v24 = vld [vmem:[%s5381_s7] sm:$0xff] }
 0x1ce   :  { %v2074_v61 = vadd.f32 %v4894_v13, %v2060_v3  ;;  %v2061_v62 = vmul.f32 %v4889_v23, %v2047_v6  ;;  %v1999_v22 = vpop.f32.mrf.mxu0  ;;  %v2037_v41 = vpop.f32.mrf.mxu1  ;;  %v2367_v32 = vsel %vm2179_vm10, %v4928_v51, 0 }
 0x1cf   :  { %v4942_v12 = vpack.c.bf16 %v2130_v40, %v2130_v40  ;;  %v2131_v7 = vmul.f32 %v4900_v8, %v2081_v25  ;;  %v2062_v53 = vmul.f32 %v4889_v23, %v2048_v39  ;;  %v2049_v27 = vadd.f32 %v2037_v41, %v1826_v58  ;;  %2154 = vrot.lane.b32.xlu0 %v4934_v4, %s4358_s11 }
 0x1d0   :  { %v2082_v28 = vmax.f32 %v2074_v61, 0.0  ;;  %v2075_v30 = vadd.f32 %v4894_v13, %v2061_v62  ;;  %v2039_v36 = vpop.f32.mrf.mxu1 }
 0x1d1   :  { %v4950_v38 = vpack.c.bf16 %v2131_v7, %v2131_v7  ;;  %v2076_v26 = vadd.f32 %v4894_v13, %v2062_v53  ;;  %v2063_v8 = vmul.f32 %v4889_v23, %v2049_v27  ;;  %2156 = vrot.lane.b32.xlu1 %v4942_v12, %s4358_s11 }
 0x1d2   :  { %v2132_v42 = vmul.f32 %v2107_v18, %v2082_v28  ;;  %v2083_v10 = vmax.f32 %v2075_v30, 0.0  ;;  %v2040_v34 = vpop.f32.mrf.mxu1 }
 0x1d3   :  { %v2084_v29 = vmax.f32 %v2076_v26, 0.0  ;;  %v2077_v14 = vadd.f32 %v4894_v13, %v2063_v8  ;;  %2158 = vrot.lane.b32.xlu0 %v4950_v38, %s4358_s11 }
 0x1d4   :  { %v4963_v23 = vpack.c.bf16 %v2132_v42, %v2132_v42  ;;  %v2133_v43 = vmul.f32 %v2111_v16, %v2083_v10  ;;  %v66_v42 = vld [vmem:[%s5379_s5 + $0x8] sm:$0xf] }
 0x1d5   :  { %v2134_v44 = vmul.f32 %v2115_v57, %v2084_v29  ;;  %v2085_v46 = vmax.f32 %v2077_v14, 0.0 }
 0x1d6   :  { %v4965_v20 = vpack.c.bf16 %v2133_v43, %v2133_v43  ;;  %2160 = vrot.lane.b32.xlu1 %v4963_v23, %s4358_s11  ;;  %v2379_v18 = vsel %vm2179_vm10, %v4963_v23, 0 }
 0x1d7   :  { %v4969_v48 = vpack.c.bf16 %v2134_v44, %v2134_v44  ;;  %v2135_v50 = vmul.f32 %v2119_v31, %v2085_v46 }
 0x1d8   :  { %2162 = vrot.lane.b32.xlu0 %v4965_v20, %s4358_s11 }
 0x1d9   :  { %v4973_v59 = vpack.c.bf16 %v2135_v50, %v2135_v50  ;;  %v2385_v55 = vsel %vm2179_vm10, %v4969_v48, 0 }
 0x1da   :  { %2164 = vrot.lane.b32.xlu1 %v4969_v48, %s4358_s11 }
 0x1dc   :  { %2166 = vrot.lane.b32.xlu0 %v4973_v59, %s4358_s11 }
 0x1de   :  { %2549 = vrot.lane.b32.xlu1 %v4928_v51, %s4360_s0 }
 0x1e0   :  { %2551 = vrot.lane.b32.xlu0 %v4934_v4, %s4360_s0 }
 0x1e2   :  { %2553 = vrot.lane.b32.xlu1 %v4942_v12, %s4360_s0 }
 0x1e4   :  { %2555 = vrot.lane.b32.xlu0 %v4950_v38, %s4360_s0 }
 0x1e6   :  { %2557 = vrot.lane.b32.xlu1 %v4963_v23, %s4360_s0 }
 0x1e8   :  { %2559 = vrot.lane.b32.xlu0 %v4965_v20, %s4360_s0 }
 0x1ea   :  { %2561 = vrot.lane.b32.xlu1 %v4969_v48, %s4360_s0 }
 0x1ec   :  { %2563 = vrot.lane.b32.xlu0 %v4973_v59, %s4360_s0 }
 0x1ee   :  { %2764 = vrot.lane.b32.xlu1 %v4928_v51, %s4361_s14 }
 0x1f0   :  { %2766 = vrot.lane.b32.xlu0 %v4934_v4, %s4361_s14 }
 0x1f2   :  { %2768 = vrot.lane.b32.xlu1 %v4942_v12, %s4361_s14 }
 0x1f4   :  { %2770 = vrot.lane.b32.xlu0 %v4950_v38, %s4361_s14 }
 0x1f6   :  { %2772 = vrot.lane.b32.xlu1 %v4963_v23, %s4361_s14 }
 0x1f8   :  { %2774 = vrot.lane.b32.xlu0 %v4965_v20, %s4361_s14 }
 0x1fa   :  { %2776 = vrot.lane.b32.xlu1 %v4969_v48, %s4361_s14 }
 0x1fc   :  { %2778 = vrot.lane.b32.xlu0 %v4973_v59, %s4361_s14 }
 0x1fe   :  { %2979 = vrot.lane.b32.xlu1 %v4928_v51, %s4362_s15 }
 0x200   :  { %2981 = vrot.lane.b32.xlu0 %v4934_v4, %s4362_s15 }
 0x202   :  { %2983 = vrot.lane.b32.xlu1 %v4942_v12, %s4362_s15 }
 0x204   :  { %2985 = vrot.lane.b32.xlu0 %v4950_v38, %s4362_s15 }
 0x206   :  { %2987 = vrot.lane.b32.xlu1 %v4963_v23, %s4362_s15 }
 0x208   :  { %2989 = vrot.lane.b32.xlu0 %v4965_v20, %s4362_s15 }
 0x20a   :  { %2991 = vrot.lane.b32.xlu1 %v4969_v48, %s4362_s15 }
 0x20c   :  { %2993 = vrot.lane.b32.xlu0 %v4973_v59, %s4362_s15 }
 0x20e   :  { %3194 = vrot.lane.b32.xlu1 %v4928_v51, %s4363_s16 }
 0x210   :  { %3196 = vrot.lane.b32.xlu0 %v4934_v4, %s4363_s16 }
 0x212   :  { %3198 = vrot.lane.b32.xlu1 %v4942_v12, %s4363_s16 }
 0x214   :  { %3200 = vrot.lane.b32.xlu0 %v4950_v38, %s4363_s16 }
 0x216   :  { %3202 = vrot.lane.b32.xlu1 %v4963_v23, %s4363_s16 }
 0x218   :  { %3204 = vrot.lane.b32.xlu0 %v4965_v20, %s4363_s16 }
 0x21a   :  { %3206 = vrot.lane.b32.xlu1 %v4969_v48, %s4363_s16 }
 0x21c   :  { %3208 = vrot.lane.b32.xlu0 %v4973_v59, %s4363_s16 }
 0x21e   :  { %3409 = vrot.lane.b32.xlu1 %v4928_v51, %s4364_s17 }
 0x220   :  { %3411 = vrot.lane.b32.xlu0 %v4934_v4, %s4364_s17 }
 0x222   :  { %3413 = vrot.lane.b32.xlu1 %v4942_v12, %s4364_s17 }
 0x224   :  { %3415 = vrot.lane.b32.xlu0 %v4950_v38, %s4364_s17 }
 0x226   :  { %3417 = vrot.lane.b32.xlu1 %v4963_v23, %s4364_s17 }
 0x228   :  { %3419 = vrot.lane.b32.xlu0 %v4965_v20, %s4364_s17 }
 0x22a   :  { %3421 = vrot.lane.b32.xlu1 %v4969_v48, %s4364_s17 }
 0x22c   :  { %3423 = vrot.lane.b32.xlu0 %v4973_v59, %s4364_s17 }
 0x22e   :  { %3624 = vrot.lane.b32.xlu1 %v4928_v51, %s4365_s18 }
 0x230   :  { %3626 = vrot.lane.b32.xlu0 %v4934_v4, %s4365_s18 }
 0x232   :  { %3628 = vrot.lane.b32.xlu1 %v4942_v12, %s4365_s18 }
 0x234   :  { %3630 = vrot.lane.b32.xlu0 %v4950_v38, %s4365_s18 }
 0x236   :  { %3632 = vrot.lane.b32.xlu1 %v4963_v23, %s4365_s18 }
 0x238   :  { %3634 = vrot.lane.b32.xlu0 %v4965_v20, %s4365_s18 }
 0x23a   :  { %3636 = vrot.lane.b32.xlu1 %v4969_v48, %s4365_s18 }
 0x23c   :  { %3638 = vrot.lane.b32.xlu0 %v4973_v59, %s4365_s18 }
 0x23e   :  { %3839 = vrot.lane.b32.xlu1 %v4928_v51, %s4366_s19  ;;  %v64_v51 = vld [vmem:[%s5379_s5] sm:$0xf] }
 0x23f   :  { %v2153_v13 = vpop.permute.xlu1 %2152 }
 0x240   :  { %3841 = vrot.lane.b32.xlu0 %v4934_v4, %s4366_s19 }
 0x241   :  { %v2155_v19 = vpop.permute.xlu0 %2154 }
 0x242   :  { %v2168_v17 = vsel %vm97_vm0, %v2153_v13, %v2155_v19  ;;  %3843 = vrot.lane.b32.xlu1 %v4942_v12, %s4366_s19 }
 0x243   :  { %v2157_v33 = vpop.permute.xlu1 %2156  ;;  %v2181_v47 = vsel %vm2179_vm10, %v2168_v17, 0 }
 0x244   :  { %3845 = vrot.lane.b32.xlu0 %v4950_v38, %s4366_s19  ;;  %v2169_v45 = vsel %vm97_vm0, %v2155_v19, %v2157_v33 }
 0x245   :  { %v2159_v21 = vpop.permute.xlu0 %2158  ;;  %4181 = vmatprep.subr.msk.bf16.mxu0 %vm2179_vm10, %v2169_v45 }
 0x246   :  { %3847 = vrot.lane.b32.xlu1 %v4963_v23, %s4366_s19  ;;  %2216 = vmatpush1.bf16.msra.mxu0 %v2181_v47  ;;  %v2170_v35 = vsel %vm97_vm0, %v2157_v33, %v2159_v21 }
 0x247   :  { %v2187_v56 = vsel %vm2179_vm10, %v2170_v35, 0 }
 0x248   :  { %3849 = vrot.lane.b32.xlu0 %v4965_v20, %s4366_s19  ;;  %v2161_v52 = vpop.permute.xlu1 %2160 }
 0x249   :  { %v2171_v54 = vsel %vm97_vm0, %v2159_v21, %v2161_v52  ;;  %4182 = vmatmul.mubr.msk.bf16.vlgmr.msra.gmra.mxu0 %vm2175_vm11, %v65_v60  ;;  %v67_v21 = vld [vmem:[%s5379_s5 + $0xc] sm:$0xf] }
 0x24a   :  { %v2163_v49 = vpop.permute.xlu0 %2162  ;;  %3851 = vrot.lane.b32.xlu1 %v4969_v48, %s4366_s19  ;;  %4183 = vmatprep.subr.msk.bf16.mxu1 %vm2179_vm10, %v2171_v54 }
 0x24b   :  { %2257 = vmatpush1.bf16.msra.mxu1 %v2187_v56  ;;  %2314 = vmatprep.mubr.bf16.mxu0 %v4359_v11  ;;  %v2172_v63 = vsel %vm97_vm0, %v2161_v52, %v2163_v49 }
 0x24c   :  { %3853 = vrot.lane.b32.xlu0 %v4973_v59, %s4366_s19  ;;  %v2165_v37 = vpop.permute.xlu1 %2164  ;;  %4262 = vmatprep.subr.bf16.mxu1 %v4367_v15  ;;  %v2193_v58 = vsel %vm2179_vm10, %v2172_v63, 0 }
 0x24d   :  { %v2173_v2 = vsel %vm97_vm0, %v2163_v49, %v2165_v37 }
 0x24e   :  { %v2167_v0 = vpop.permute.xlu0 %2166  ;;  %4057 = vperm.xlu1 %4331, %v4054_v1   ;;  %4184 = vmatmul.mubr.msk.bf16.vlgmr.msra.gmra.mxu1 %vm2175_vm11, %v65_v60 }
 0x24f   :  { %v2174_v3 = vsel %vm97_vm0, %v2165_v37, %v2167_v0  ;;  %4185 = vmatprep.subr.msk.bf16.mxu0 %vm2179_vm10, %v2173_v2  ;;  %4264 = vmatprep.mubr.msk.bf16.mxu1 %vm4368_vm12, %v4367_v15 }
 0x250   :  { %v2199_v6 = vsel %vm2179_vm10, %v2174_v3, 0  ;;  %2297 = vmatpush1.bf16.msra.mxu0 %v2193_v58  ;;  %4069 = vperm.xlu0 %4330, %v4066_v24   ;;  %v2550_v9 = vpop.permute.xlu1 %2549 }
 0x251   :  { %4188 = vmatprep.subr.msk.bf16.mxu0 %vm2179_vm10, %v4934_v4  ;;  %4263 = vmatpush3.bf16.msra.mxu1 %v2199_v6  ;;  %v2373_v4 = vsel %vm2179_vm10, %v4942_v12, 0 }
 0x252   :  { %v2552_v5 = vpop.permute.xlu0 %2551  ;;  %4190 = vmatprep.subr.msk.bf16.mxu1 %vm2179_vm10, %v4950_v38 }
 0x253   :  { %4186 = vmatmul.mubr.msk.bf16.vlgmr.msra.gmra.mxu0 %vm2175_vm11, %v65_v60  ;;  %v2565_v7 = vsel %vm505_vm3, %v2550_v9, %v2552_v5 }
 0x254   :  { %2402 = vmatpush1.bf16.msra.mxu0 %v2367_v32  ;;  %v2554_v40 = vpop.permute.xlu1 %2553  ;;  %2419 = vmatprep.mubr.bf16.mxu0 %v4359_v11  ;;  %v2576_v28 = vsel %vm2179_vm10, %v2565_v7, 0 }
 0x255   :  { %4192 = vmatprep.subr.msk.bf16.mxu0 %vm2179_vm10, %v4965_v20  ;;  %v2566_v62 = vsel %vm505_vm3, %v2552_v5, %v2554_v40 }
 0x256   :  { %v2556_v25 = vpop.permute.xlu0 %2555  ;;  %4265 = vmatmul.mubr.msk.bf16.vlgmr.msra.gmra.mxu1 %vm2175_vm11, %v65_v60 }
 0x257   :  { %2443 = vmatpush1.bf16.msra.mxu1 %v2373_v4  ;;  %2460 = vmatprep.mubr.bf16.mxu1 %v4359_v11  ;;  %v2567_v30 = vsel %vm505_vm3, %v2554_v40, %v2556_v25 }
 0x258   :  { %v2558_v39 = vpop.permute.xlu1 %2557  ;;  %4268 = vmatprep.subr.bf16.mxu1 %v4367_v15  ;;  %v2582_v38 = vsel %vm2179_vm10, %v2567_v30, 0 }
 0x259   :  { %v2568_v12 = vsel %vm505_vm3, %v2556_v25, %v2558_v39  ;;  %v68_v25 = vld [vmem:[%s5379_s5 + $0x10] sm:$0xf] }
 0x25a   :  { %v2560_v61 = vpop.permute.xlu0 %2559 }
 0x25b   :  { %4189 = vmatmul.mubr.msk.bf16.vlgmr.msra.gmra.mxu0 %vm2175_vm11, %v64_v51  ;;  %v2569_v57 = vsel %vm505_vm3, %v2558_v39, %v2560_v61 }
 0x25c   :  { %2483 = vmatpush1.bf16.msra.mxu0 %v2379_v18  ;;  %v2562_v22 = vpop.permute.xlu1 %2561  ;;  %2500 = vmatprep.mubr.bf16.mxu0 %v4359_v11  ;;  %v2588_v34 = vsel %vm2179_vm10, %v2569_v57, 0  ;;  %v69_v57 = vld [vmem:[%s5379_s5 + $0x14] sm:$0xf] }
 0x25d   :  { %4195 = vmatprep.subr.msk.bf16.mxu0 %vm2179_vm10, %v2566_v62  ;;  %v2570_v16 = vsel %vm505_vm3, %v2560_v61, %v2562_v22 }
 0x25e   :  { %v2564_v41 = vpop.permute.xlu0 %2563  ;;  %4191 = vmatmul.mubr.msk.bf16.vlgmr.msra.gmra.mxu1 %vm2175_vm11, %v64_v51 }
 0x25f   :  { %4269 = vmatpush3.bf16.msra.mxu1 %v2385_v55  ;;  %4270 = vmatprep.mubr.msk.bf16.mxu1 %vm4368_vm12, %v4367_v15  ;;  %v2571_v29 = vsel %vm505_vm3, %v2562_v22, %v2564_v41 }
 0x260   :  { %4197 = vmatprep.subr.msk.bf16.mxu1 %vm2179_vm10, %v2568_v12  ;;  %v2765_v53 = vpop.permute.xlu1 %2764  ;;  %v2594_v23 = vsel %vm2179_vm10, %v2571_v29, 0 }
 0x262   :  { %v2767_v27 = vpop.permute.xlu0 %2766 }
 0x263   :  { %4193 = vmatmul.mubr.msk.bf16.vlgmr.msra.gmra.mxu0 %vm2175_vm11, %v64_v51  ;;  %v2780_v46 = vsel %vm728_vm4, %v2765_v53, %v2767_v27 }
 0x264   :  { %2611 = vmatpush1.bf16.msra.mxu0 %v2576_v28  ;;  %v2769_v36 = vpop.permute.xlu1 %2768  ;;  %2628 = vmatprep.mubr.bf16.mxu0 %v4359_v11  ;;  %v2791_v50 = vsel %vm2179_vm10, %v2780_v46, 0 }
 0x265   :  { %4199 = vmatprep.subr.msk.bf16.mxu0 %vm2179_vm10, %v2570_v16  ;;  %v2781_v14 = vsel %vm728_vm4, %v2767_v27, %v2769_v36 }
 0x266   :  { %v2771_v26 = vpop.permute.xlu0 %2770  ;;  %4271 = vmatmul.mubr.msk.bf16.vlgmr.msra.gmra.mxu1 %vm2175_vm11, %v64_v51 }
 0x267   :  { %2652 = vmatpush1.bf16.msra.mxu1 %v2582_v38  ;;  %2669 = vmatprep.mubr.bf16.mxu1 %v4359_v11  ;;  %v2782_v59 = vsel %vm728_vm4, %v2769_v36, %v2771_v26 }
 0x268   :  { %v2773_v8 = vpop.permute.xlu1 %2772  ;;  %4274 = vmatprep.subr.bf16.mxu1 %v4367_v15  ;;  %v2797_v17 = vsel %vm2179_vm10, %v2782_v59, 0 }
 0x269   :  { %v2783_v44 = vsel %vm728_vm4, %v2771_v26, %v2773_v8 }
 0x26a   :  { %v2775_v10 = vpop.permute.xlu0 %2774 }
 0x26b   :  { %4196 = vmatmul.mubr.msk.bf16.vlgmr.msra.gmra.mxu0 %vm2175_vm11, %v66_v42  ;;  %v2784_v45 = vsel %vm728_vm4, %v2773_v8, %v2775_v10 }
 0x26c   :  { %2692 = vmatpush1.bf16.msra.mxu0 %v2588_v34  ;;  %v2777_v31 = vpop.permute.xlu1 %2776  ;;  %2709 = vmatprep.mubr.bf16.mxu0 %v4359_v11  ;;  %v2803_v35 = vsel %vm2179_vm10, %v2784_v45, 0  ;;  %v70_v45 = vld [vmem:[%s5379_s5 + $0x18] sm:$0xf] }
 0x26d   :  { %4202 = vmatprep.subr.msk.bf16.mxu0 %vm2179_vm10, %v2781_v14  ;;  %v2785_v13 = vsel %vm728_vm4, %v2775_v10, %v2777_v31 }
 0x26e   :  { %v2779_v43 = vpop.permute.xlu0 %2778  ;;  %4198 = vmatmul.mubr.msk.bf16.vlgmr.msra.gmra.mxu1 %vm2175_vm11, %v66_v42 }
 0x26f   :  { %4275 = vmatpush3.bf16.msra.mxu1 %v2594_v23  ;;  %4276 = vmatprep.mubr.msk.bf16.mxu1 %vm4368_vm12, %v4367_v15  ;;  %v2786_v52 = vsel %vm728_vm4, %v2777_v31, %v2779_v43 }
 0x270   :  { %4204 = vmatprep.subr.msk.bf16.mxu1 %vm2179_vm10, %v2783_v44  ;;  %v2980_v20 = vpop.permute.xlu1 %2979  ;;  %v2809_v49 = vsel %vm2179_vm10, %v2786_v52, 0 }
 0x272   :  { %v2982_v48 = vpop.permute.xlu0 %2981 }
 0x273   :  { %4200 = vmatmul.mubr.msk.bf16.vlgmr.msra.gmra.mxu0 %vm2175_vm11, %v66_v42  ;;  %v2995_v37 = vsel %vm951_vm5, %v2980_v20, %v2982_v48 }
 0x274   :  { %2826 = vmatpush1.bf16.msra.mxu0 %v2791_v50  ;;  %v2984_v19 = vpop.permute.xlu1 %2983  ;;  %2843 = vmatprep.mubr.bf16.mxu0 %v4359_v11  ;;  %v3006_v0 = vsel %vm2179_vm10, %v2995_v37, 0 }
 0x275   :  { %4206 = vmatprep.subr.msk.bf16.mxu0 %vm2179_vm10, %v2785_v13  ;;  %v2996_v54 = vsel %vm951_vm5, %v2982_v48, %v2984_v19 }
 0x276   :  { %v2986_v33 = vpop.permute.xlu0 %2985  ;;  %4277 = vmatmul.mubr.msk.bf16.vlgmr.msra.gmra.mxu1 %vm2175_vm11, %v66_v42 }
 0x277   :  { %2867 = vmatpush1.bf16.msra.mxu1 %v2797_v17  ;;  %2884 = vmatprep.mubr.bf16.mxu1 %v4359_v11  ;;  %v2997_v58 = vsel %vm951_vm5, %v2984_v19, %v2986_v33 }
 0x278   :  { %v2988_v47 = vpop.permute.xlu1 %2987  ;;  %4280 = vmatprep.subr.bf16.mxu1 %v4367_v15  ;;  %v3012_v9 = vsel %vm2179_vm10, %v2997_v58, 0 }
 0x279   :  { %v2998_v63 = vsel %vm951_vm5, %v2986_v33, %v2988_v47 }
 0x27a   :  { %v2990_v60 = vpop.permute.xlu0 %2989 }
 0x27b   :  { %4203 = vmatmul.mubr.msk.bf16.vlgmr.msra.gmra.mxu0 %vm2175_vm11, %v67_v21  ;;  %v2999_v32 = vsel %vm951_vm5, %v2988_v47, %v2990_v60 }
 0x27c   :  { %2907 = vmatpush1.bf16.msra.mxu0 %v2803_v35  ;;  %v2992_v56 = vpop.permute.xlu1 %2991  ;;  %2924 = vmatprep.mubr.bf16.mxu0 %v4359_v11  ;;  %v3018_v39 = vsel %vm2179_vm10, %v2999_v32, 0 }
 0x27d   :  { %4209 = vmatprep.subr.msk.bf16.mxu0 %vm2179_vm10, %v2996_v54  ;;  %v3000_v3 = vsel %vm951_vm5, %v2990_v60, %v2992_v56 }
 0x27e   :  { %v2994_v1 = vpop.permute.xlu0 %2993  ;;  %4205 = vmatmul.mubr.msk.bf16.vlgmr.msra.gmra.mxu1 %vm2175_vm11, %v67_v21 }
 0x27f   :  { %4281 = vmatpush3.bf16.msra.mxu1 %v2809_v49  ;;  %4282 = vmatprep.mubr.msk.bf16.mxu1 %vm4368_vm12, %v4367_v15  ;;  %v3001_v51 = vsel %vm951_vm5, %v2992_v56, %v2994_v1 }
 0x280   :  { %4211 = vmatprep.subr.msk.bf16.mxu1 %vm2179_vm10, %v2998_v63  ;;  %v3195_v2 = vpop.permute.xlu1 %3194  ;;  %v3024_v62 = vsel %vm2179_vm10, %v3001_v51, 0 }
 0x282   :  { %v3197_v24 = vpop.permute.xlu0 %3196 }
 0x283   :  { %4207 = vmatmul.mubr.msk.bf16.vlgmr.msra.gmra.mxu0 %vm2175_vm11, %v67_v21  ;;  %v3210_v55 = vsel %vm1174_vm6, %v3195_v2, %v3197_v24 }
 0x284   :  { %3041 = vmatpush1.bf16.msra.mxu0 %v3006_v0  ;;  %v3199_v6 = vpop.permute.xlu1 %3198  ;;  %3058 = vmatprep.mubr.bf16.mxu0 %v4359_v11  ;;  %v3221_v53 = vsel %vm2179_vm10, %v3210_v55, 0 }
 0x285   :  { %4213 = vmatprep.subr.msk.bf16.mxu0 %vm2179_vm10, %v3000_v3  ;;  %v3211_v61 = vsel %vm1174_vm6, %v3197_v24, %v3199_v6 }
 0x286   :  { %v3201_v5 = vpop.permute.xlu0 %3200  ;;  %4283 = vmatmul.mubr.msk.bf16.vlgmr.msra.gmra.mxu1 %vm2175_vm11, %v67_v21 }
 0x287   :  { %3082 = vmatpush1.bf16.msra.mxu1 %v3012_v9  ;;  %3099 = vmatprep.mubr.bf16.mxu1 %v4359_v11  ;;  %v3212_v27 = vsel %vm1174_vm6, %v3199_v6, %v3201_v5  ;;  %v71_v9 = vld [vmem:[%s5379_s5 + $0x1c] sm:$0xf] }
 0x288   :  { %v3203_v40 = vpop.permute.xlu1 %3202  ;;  %4286 = vmatprep.subr.bf16.mxu1 %v4367_v15  ;;  %v3227_v16 = vsel %vm2179_vm10, %v3212_v27, 0  ;;  %v72_v27 = vld [vmem:[%s5379_s5 + $0x20] sm:$0xf]  ;;  %s4369_s5 = smov [#allocation2]  }
 0x289   :  { %v3213_v41 = vsel %vm1174_vm6, %v3201_v5, %v3203_v40  ;;  %s4098_s20 = sshll.u32 %s4369_s5, 4  ;;  %s4099_s20 = int_to_ptr.vmem [resolvable:$true] %s4098_s20 }
 0x28a   :  { %v3205_v4 = vpop.permute.xlu0 %3204  ;;  %s4336_s21 = scalar_lea.vmem %s4099_s20, 1024  ;;  %p4341_p1 = scmp.lt.s32.totalorder %s4099_s20, %s4099_s20 }
 0x28b   :  { %4210 = vmatmul.mubr.msk.bf16.vlgmr.msra.gmra.mxu0 %vm2175_vm11, %v68_v25  ;;  %v3214_v38 = vsel %vm1174_vm6, %v3203_v40, %v3205_v4  ;;  %p4337_p0 = scmp.ne.s32.totalorder %s4099_s20, %s4336_s21  ;;  %p4342_p2 = scmp.lt.s32.totalorder %s4336_s21, %s4336_s21 }
 0x28c   :  { %3122 = vmatpush1.bf16.msra.mxu0 %v3018_v39  ;;  %v3207_v18 = vpop.permute.xlu1 %3206  ;;  %3139 = vmatprep.mubr.bf16.mxu0 %v4359_v11  ;;  %v3233_v42 = vsel %vm2179_vm10, %v3214_v38, 0 }
 0x28d   :  { %4216 = vmatprep.subr.msk.bf16.mxu0 %vm2179_vm10, %v3211_v61  ;;  %v3215_v28 = vsel %vm1174_vm6, %v3205_v4, %v3207_v18  ;;  %p4343_p3 = por %p4342_p2, %p4341_p1 }
 0x28e   :  { %v3209_v22 = vpop.permute.xlu0 %3208  ;;  %4212 = vmatmul.mubr.msk.bf16.vlgmr.msra.gmra.mxu1 %vm2175_vm11, %v68_v25 }
 0x28f   :  { %4287 = vmatpush3.bf16.msra.mxu1 %v3024_v62  ;;  %4288 = vmatprep.mubr.msk.bf16.mxu1 %vm4368_vm12, %v4367_v15  ;;  %v3216_v10 = vsel %vm1174_vm6, %v3207_v18, %v3209_v22  ;;  %p4344_p4 = pnand %p4343_p3, %p4337_p0 }
 0x290   :  { %4218 = vmatprep.subr.msk.bf16.mxu1 %vm2179_vm10, %v3213_v41  ;;  %v3410_v12 = vpop.permute.xlu1 %3409  ;;  %v3239_v14 = vsel %vm2179_vm10, %v3216_v10, 0 }
 0x292   :  { %v3412_v7 = vpop.permute.xlu0 %3411 }
 0x293   :  { %4214 = vmatmul.mubr.msk.bf16.vlgmr.msra.gmra.mxu0 %vm2175_vm11, %v68_v25  ;;  %v3425_v43 = vsel %vm1397_vm7, %v3410_v12, %v3412_v7 }
 0x294   :  { %3256 = vmatpush1.bf16.msra.mxu0 %v3221_v53  ;;  %v3414_v30 = vpop.permute.xlu1 %3413  ;;  %3273 = vmatprep.mubr.bf16.mxu0 %v4359_v11  ;;  %v3436_v20 = vsel %vm2179_vm10, %v3425_v43, 0 }
 0x295   :  { %4220 = vmatprep.subr.msk.bf16.mxu0 %vm2179_vm10, %v3215_v28  ;;  %v3426_v34 = vsel %vm1397_vm7, %v3412_v7, %v3414_v30 }
 0x296   :  { %v3416_v36 = vpop.permute.xlu0 %3415  ;;  %4289 = vmatmul.mubr.msk.bf16.vlgmr.msra.gmra.mxu1 %vm2175_vm11, %v68_v25 }
 0x297   :  { %3297 = vmatpush1.bf16.msra.mxu1 %v3227_v16  ;;  %3314 = vmatprep.mubr.bf16.mxu1 %v4359_v11  ;;  %v3427_v48 = vsel %vm1397_vm7, %v3414_v30, %v3416_v36 }
 0x298   :  { %v3418_v26 = vpop.permute.xlu1 %3417  ;;  %4292 = vmatprep.subr.bf16.mxu1 %v4367_v15  ;;  %v3442_v13 = vsel %vm2179_vm10, %v3427_v48, 0 }
 0x299   :  { %v3428_v23 = vsel %vm1397_vm7, %v3416_v36, %v3418_v26 }
 0x29a   :  { %v3420_v8 = vpop.permute.xlu0 %3419 }
 0x29b   :  { %4217 = vmatmul.mubr.msk.bf16.vlgmr.msra.gmra.mxu0 %vm2175_vm11, %v69_v57  ;;  %v3429_v17 = vsel %vm1397_vm7, %v3418_v26, %v3420_v8 }
 0x29c   :  { %3337 = vmatpush1.bf16.msra.mxu0 %v3233_v42  ;;  %v3422_v29 = vpop.permute.xlu1 %3421  ;;  %3354 = vmatprep.mubr.bf16.mxu0 %v4359_v11  ;;  %v3448_v21 = vsel %vm2179_vm10, %v3429_v17, 0 }
 0x29d   :  { %4223 = vmatprep.subr.msk.bf16.mxu0 %vm2179_vm10, %v3426_v34  ;;  %v3430_v50 = vsel %vm1397_vm7, %v3420_v8, %v3422_v29 }
 0x29e   :  { %v3424_v31 = vpop.permute.xlu0 %3423  ;;  %4219 = vmatmul.mubr.msk.bf16.vlgmr.msra.gmra.mxu1 %vm2175_vm11, %v69_v57 }
 0x29f   :  { %4293 = vmatpush3.bf16.msra.mxu1 %v3239_v14  ;;  %4294 = vmatprep.mubr.msk.bf16.mxu1 %vm4368_vm12, %v4367_v15  ;;  %v3431_v60 = vsel %vm1397_vm7, %v3422_v29, %v3424_v31 }
 0x2a0   :  { %4225 = vmatprep.subr.msk.bf16.mxu1 %vm2179_vm10, %v3428_v23  ;;  %v3625_v44 = vpop.permute.xlu1 %3624  ;;  %v3454_v54 = vsel %vm2179_vm10, %v3431_v60, 0 }
 0x2a2   :  { %v3627_v46 = vpop.permute.xlu0 %3626 }
 0x2a3   :  { %4221 = vmatmul.mubr.msk.bf16.vlgmr.msra.gmra.mxu0 %vm2175_vm11, %v69_v57  ;;  %v3640_v49 = vsel %vm1620_vm8, %v3625_v44, %v3627_v46 }
 0x2a4   :  { %3471 = vmatpush1.bf16.msra.mxu0 %v3436_v20  ;;  %v3629_v59 = vpop.permute.xlu1 %3628  ;;  %3488 = vmatprep.mubr.bf16.mxu0 %v4359_v11  ;;  %v3651_v37 = vsel %vm2179_vm10, %v3640_v49, 0 }
 0x2a5   :  { %4227 = vmatprep.subr.msk.bf16.mxu0 %vm2179_vm10, %v3430_v50  ;;  %v3641_v35 = vsel %vm1620_vm8, %v3627_v46, %v3629_v59 }
 0x2a6   :  { %v3631_v19 = vpop.permute.xlu0 %3630  ;;  %4295 = vmatmul.mubr.msk.bf16.vlgmr.msra.gmra.mxu1 %vm2175_vm11, %v69_v57 }
 0x2a7   :  { %3512 = vmatpush1.bf16.msra.mxu1 %v3442_v13  ;;  %3529 = vmatprep.mubr.bf16.mxu1 %v4359_v11  ;;  %v3642_v2 = vsel %vm1620_vm8, %v3629_v59, %v3631_v19 }
 0x2a8   :  { %v3633_v33 = vpop.permute.xlu1 %3632  ;;  %4298 = vmatprep.subr.bf16.mxu1 %v4367_v15  ;;  %v3657_v58 = vsel %vm2179_vm10, %v3642_v2, 0 }
 0x2a9   :  { %v3643_v56 = vsel %vm1620_vm8, %v3631_v19, %v3633_v33 }
 0x2aa   :  { %v3635_v47 = vpop.permute.xlu0 %3634 }
 0x2ab   :  { %4224 = vmatmul.mubr.msk.bf16.vlgmr.msra.gmra.mxu0 %vm2175_vm11, %v70_v45  ;;  %v3644_v6 = vsel %vm1620_vm8, %v3633_v33, %v3635_v47 }
 0x2ac   :  { %3552 = vmatpush1.bf16.msra.mxu0 %v3448_v21  ;;  %v3637_v52 = vpop.permute.xlu1 %3636  ;;  %3569 = vmatprep.mubr.bf16.mxu0 %v4359_v11  ;;  %v3663_v5 = vsel %vm2179_vm10, %v3644_v6, 0 }
 0x2ad   :  { %4230 = vmatprep.subr.msk.bf16.mxu0 %vm2179_vm10, %v3641_v35  ;;  %v3645_v24 = vsel %vm1620_vm8, %v3635_v47, %v3637_v52 }
 0x2ae   :  { %4226 = vmatmul.mubr.msk.bf16.vlgmr.msra.gmra.mxu1 %vm2175_vm11, %v70_v45  ;;  %v3639_v1 = vpop.permute.xlu0 %3638 }
 0x2af   :  { %4299 = vmatpush3.bf16.msra.mxu1 %v3454_v54  ;;  %4300 = vmatprep.mubr.msk.bf16.mxu1 %vm4368_vm12, %v4367_v15  ;;  %v3646_v32 = vsel %vm1620_vm8, %v3637_v52, %v3639_v1 }
 0x2b0   :  { %4232 = vmatprep.subr.msk.bf16.mxu1 %vm2179_vm10, %v3643_v56  ;;  %v3840_v63 = vpop.permute.xlu1 %3839  ;;  %v3669_v39 = vsel %vm2179_vm10, %v3646_v32, 0 }
 0x2b2   :  { %v3842_v3 = vpop.permute.xlu0 %3841 }
 0x2b3   :  { %4228 = vmatmul.mubr.msk.bf16.vlgmr.msra.gmra.mxu0 %vm2175_vm11, %v70_v45  ;;  %v3855_v61 = vsel %vm1843_vm9, %v3840_v63, %v3842_v3 }
 0x2b4   :  { %3686 = vmatpush1.bf16.msra.mxu0 %v3651_v37  ;;  %3703 = vmatprep.mubr.bf16.mxu0 %v4359_v11  ;;  %v3844_v0 = vpop.permute.xlu1 %3843  ;;  %v3866_v22 = vsel %vm2179_vm10, %v3855_v61, 0 }
 0x2b5   :  { %4234 = vmatprep.subr.msk.bf16.mxu0 %vm2179_vm10, %v3645_v24  ;;  %v3856_v25 = vsel %vm1843_vm9, %v3842_v3, %v3844_v0 }
 0x2b6   :  { %4301 = vmatmul.mubr.msk.bf16.vlgmr.msra.gmra.mxu1 %vm2175_vm11, %v70_v45  ;;  %v3846_v4 = vpop.permute.xlu0 %3845 }
 0x2b7   :  { %3727 = vmatpush1.bf16.msra.mxu1 %v3657_v58  ;;  %3744 = vmatprep.mubr.bf16.mxu1 %v4359_v11  ;;  %v3857_v41 = vsel %vm1843_vm9, %v3844_v0, %v3846_v4 }
 0x2b8   :  { %4304 = vmatprep.subr.bf16.mxu1 %v4367_v15  ;;  %v3848_v40 = vpop.permute.xlu1 %3847  ;;  %v3872_v12 = vsel %vm2179_vm10, %v3857_v41, 0 }
 0x2b9   :  { %v3858_v51 = vsel %vm1843_vm9, %v3846_v4, %v3848_v40 }
 0x2ba   :  { %v3850_v62 = vpop.permute.xlu0 %3849 }
 0x2bb   :  { %4231 = vmatmul.mubr.msk.bf16.vlgmr.msra.gmra.mxu0 %vm2175_vm11, %v71_v9  ;;  %v3859_v7 = vsel %vm1843_vm9, %v3848_v40, %v3850_v62 }
 0x2bc   :  { %3767 = vmatpush1.bf16.msra.mxu0 %v3663_v5  ;;  %3784 = vmatprep.mubr.bf16.mxu0 %v4359_v11  ;;  %v3852_v18 = vpop.permute.xlu1 %3851  ;;  %v3878_v28 = vsel %vm2179_vm10, %v3859_v7, 0 }
 0x2bd   :  { %4237 = vmatprep.subr.msk.bf16.mxu0 %vm2179_vm10, %v3856_v25  ;;  %v3860_v55 = vsel %vm1843_vm9, %v3850_v62, %v3852_v18 }
 0x2be   :  { %4233 = vmatmul.mubr.msk.bf16.vlgmr.msra.gmra.mxu1 %vm2175_vm11, %v71_v9  ;;  %v3854_v53 = vpop.permute.xlu0 %3853 }
 0x2bf   :  { %4305 = vmatpush3.bf16.msra.mxu1 %v3669_v39  ;;  %4306 = vmatprep.mubr.msk.bf16.mxu1 %vm4368_vm12, %v4367_v15  ;;  %v3861_v30 = vsel %vm1843_vm9, %v3852_v18, %v3854_v53 }
 0x2c0   :  { %4239 = vmatprep.subr.msk.bf16.mxu1 %vm2179_vm10, %v3858_v51  ;;  %v3884_v16 = vsel %vm2179_vm10, %v3861_v30, 0 }
 0x2c3   :  { %4235 = vmatmul.mubr.msk.bf16.vlgmr.msra.gmra.mxu0 %vm2175_vm11, %v71_v9 }
 0x2c4   :  { %3901 = vmatpush1.bf16.msra.mxu0 %v3866_v22  ;;  %3918 = vmatprep.mubr.bf16.mxu0 %v4359_v11 }
 0x2c5   :  { %4241 = vmatprep.subr.msk.bf16.mxu0 %vm2179_vm10, %v3860_v55 }
 0x2c6   :  { %4307 = vmatmul.mubr.msk.bf16.vlgmr.msra.gmra.mxu1 %vm2175_vm11, %v71_v9 }
 0x2c7   :  { %3942 = vmatpush1.bf16.msra.mxu1 %v3872_v12  ;;  %3959 = vmatprep.mubr.bf16.mxu1 %v4359_v11 }
 0x2c8   :  { %4310 = vmatprep.subr.bf16.mxu1 %v4367_v15 }
 0x2cb   :  { %4238 = vmatmul.mubr.msk.bf16.vlgmr.msra.gmra.mxu0 %vm2175_vm11, %v72_v27 }
 0x2cc   :  { %3982 = vmatpush1.bf16.msra.mxu0 %v3878_v28  ;;  %3999 = vmatprep.mubr.bf16.mxu0 %v4359_v11 }
 0x2ce   :  { %4240 = vmatmul.mubr.msk.bf16.vlgmr.msra.gmra.mxu1 %vm2175_vm11, %v72_v27 }
 0x2cf   :  { %4311 = vmatpush3.bf16.msra.mxu1 %v3884_v16  ;;  %4312 = vmatprep.mubr.msk.bf16.mxu1 %vm4368_vm12, %v4367_v15 }
 0x2d3   :  { %4242 = vmatmul.mubr.msk.bf16.vlgmr.msra.gmra.mxu0 %vm2175_vm11, %v72_v27 }
 0x2d6   :  { %4313 = vmatmul.mubr.msk.bf16.vlgmr.msra.gmra.mxu1 %vm2175_vm11, %v72_v27 }
 0x309   :  { %v2235_v36 = vpop.f32.mrf.mxu0 }
 0x30b   :  { %v2237_v38 = vpop.f32.mrf.mxu0 }
 0x30d   :  { %v2239_v26 = vpop.f32.mrf.mxu0 }
 0x30e   :  { %v2276_v57 = vpop.f32.mrf.mxu1 }
 0x30f   :  { %v2240_v8 = vpop.f32.mrf.mxu0 }
 0x310   :  { %v2278_v42 = vpop.f32.mrf.mxu1 }
 0x312   :  { %v2279_v10 = vpop.f32.mrf.mxu1 }
 0x313   :  { %v2316_v11 = vpop.f32.mrf.mxu0 }
 0x314   :  { %v2280_v34 = vpop.f32.mrf.mxu1 }
 0x315   :  { %v2318_v29 = vpop.f32.mrf.mxu0 }
 0x316   :  { %v2357_v14 = vpop.f32.mrf.mxu1 }
 0x317   :  { %v2320_v31 = vpop.f32.mrf.mxu0 }
 0x318   :  { %v4266_v23 = vpop.f32.mrf.mxu1 }
 0x319   :  { %v2321_v43 = vpop.f32.mrf.mxu0 }
 0x31a   :  { %v2360_v44 = vpop.f32.mrf.mxu1 }
 0x31b   :  { %v2421_v15 = vpop.f32.mrf.mxu0 }
 0x31c   :  { %v2422_v46 = vadd.f32 %v2421_v15, %v2235_v36  ;;  %v4267_v20 = vpop.f32.mrf.mxu1 }
 0x31d   :  { %v2423_v48 = vpop.f32.mrf.mxu0 }
 0x31e   :  { %v2424_v50 = vadd.f32 %v2423_v48, %v2237_v38  ;;  %v2462_v59 = vpop.f32.mrf.mxu1 }
 0x31f   :  { %v2425_v13 = vpop.f32.mrf.mxu0  ;;  %v2463_v19 = vadd.f32 %v2462_v59, %v2276_v57 }
 0x320   :  { %v2464_v17 = vpop.f32.mrf.mxu1 }
 0x321   :  { %v2426_v33 = vpop.f32.mrf.mxu0 }
 0x322   :  { %v2465_v45 = vpop.f32.mrf.mxu1 }
 0x323   :  { %v2502_v47 = vpop.f32.mrf.mxu0 }
 0x324   :  { %v2503_v21 = vadd.f32 %v2502_v47, %v2316_v11  ;;  %v2466_v60 = vpop.f32.mrf.mxu1 }
 0x325   :  { %v2504_v35 = vpop.f32.mrf.mxu0 }
 0x326   :  { %v2505_v52 = vadd.f32 %v2504_v35, %v2318_v29  ;;  %v2543_v54 = vpop.f32.mrf.mxu1 }
 0x327   :  { %v2506_v56 = vpop.f32.mrf.mxu0  ;;  %v2544_v49 = vadd.f32 %v2543_v54, %v2357_v14 }
 0x328   :  { %v4272_v1 = vpop.f32.mrf.mxu1 }
 0x329   :  { %v2507_v63 = vpop.f32.mrf.mxu0 }
 0x32a   :  { %v2546_v37 = vpop.f32.mrf.mxu1 }
 0x32b   :  { %v2630_v2 = vpop.f32.mrf.mxu0 }
 0x32c   :  { %v2758_v24 = vadd.f32 %v2630_v2, %v2422_v46  ;;  %v4273_v0 = vpop.f32.mrf.mxu1 }
 0x32d   :  { %v2632_v58 = vpop.f32.mrf.mxu0 }
 0x32e   :  { %v2759_v3 = vadd.f32 %v2632_v58, %v2424_v50  ;;  %v2671_v6 = vpop.f32.mrf.mxu1 }
 0x32f   :  { %v2634_v9 = vpop.f32.mrf.mxu0  ;;  %v2760_v5 = vadd.f32 %v2671_v6, %v2463_v19 }
 0x330   :  { %v2673_v32 = vpop.f32.mrf.mxu1 }
 0x331   :  { %v2635_v40 = vpop.f32.mrf.mxu0 }
 0x332   :  { %v2674_v25 = vpop.f32.mrf.mxu1 }
 0x333   :  { %v2711_v4 = vpop.f32.mrf.mxu0 }
 0x334   :  { %v2761_v39 = vadd.f32 %v2711_v4, %v2503_v21  ;;  %v2675_v51 = vpop.f32.mrf.mxu1 }
 0x335   :  { %v2713_v61 = vpop.f32.mrf.mxu0 }
 0x336   :  { %v2762_v18 = vadd.f32 %v2713_v61, %v2505_v52  ;;  %v2752_v62 = vpop.f32.mrf.mxu1 }
 0x337   :  { %v2715_v22 = vpop.f32.mrf.mxu0  ;;  %v2763_v41 = vadd.f32 %v2752_v62, %v2544_v49 }
 0x338   :  { %v4278_v55 = vpop.f32.mrf.mxu1 }
 0x339   :  { %v2716_v12 = vpop.f32.mrf.mxu0 }
 0x33a   :  { %v2755_v7 = vpop.f32.mrf.mxu1 }
 0x33b   :  { %v2845_v53 = vpop.f32.mrf.mxu0 }
 0x33c   :  { %v5338_v27 = vadd.f32 %v2845_v53, %v2758_v24  ;;  %v4279_v28 = vpop.f32.mrf.mxu1 }
 0x33d   :  { %v2847_v30 = vpop.f32.mrf.mxu0 }
 0x33e   :  { %v5340_v16 = vadd.f32 %v2847_v30, %v2759_v3  ;;  %v2886_v36 = vpop.f32.mrf.mxu1 }
 0x33f   :  { %v2849_v38 = vpop.f32.mrf.mxu0  ;;  %v5342_v26 = vadd.f32 %v2886_v36, %v2760_v5 }
 0x340   :  { %v2888_v57 = vpop.f32.mrf.mxu1 }
 0x341   :  { %v2850_v8 = vpop.f32.mrf.mxu0 }
 0x342   :  { %v2889_v42 = vpop.f32.mrf.mxu1 }
 0x343   :  { %v2926_v10 = vpop.f32.mrf.mxu0 }
 0x344   :  { %v5344_v11 = vadd.f32 %v2926_v10, %v2761_v39  ;;  %v2890_v34 = vpop.f32.mrf.mxu1 }
 0x345   :  { %v2928_v29 = vpop.f32.mrf.mxu0 }
 0x346   :  { %v5346_v14 = vadd.f32 %v2928_v29, %v2762_v18  ;;  %v2967_v31 = vpop.f32.mrf.mxu1 }
 0x347   :  { %v2930_v23 = vpop.f32.mrf.mxu0  ;;  %v5348_v43 = vadd.f32 %v2967_v31, %v2763_v41 }
 0x348   :  { %v4284_v44 = vpop.f32.mrf.mxu1 }
 0x349   :  { %v2931_v15 = vpop.f32.mrf.mxu0 }
 0x34a   :  { %v2970_v46 = vpop.f32.mrf.mxu1 }
 0x34b   :  { %v3060_v20 = vpop.f32.mrf.mxu0 }
 0x34c   :  { %v4285_v48 = vpop.f32.mrf.mxu1  ;;  %v3188_v46 = vadd.f32 %v3060_v20, %v5338_v27 }
 0x34d   :  { %v3062_v50 = vpop.f32.mrf.mxu0 }
 0x34e   :  { %v3101_v59 = vpop.f32.mrf.mxu1 }
 0x34f   :  { %v3064_v13 = vpop.f32.mrf.mxu0 }
 0x350   :  { %v3103_v19 = vpop.f32.mrf.mxu1 }
 0x351   :  { %v3065_v17 = vpop.f32.mrf.mxu0  ;;  %v3189_v19 = vadd.f32 %v3062_v50, %v5340_v16 }
 0x352   :  { %v3104_v33 = vpop.f32.mrf.mxu1 }
 0x353   :  { %v5350_v45 = vpop.f32.mrf.mxu0 }
 0x354   :  { %v3105_v47 = vpop.f32.mrf.mxu1  ;;  %v3191_v27 = vadd.f32 %v5350_v45, %v5344_v11 }
 0x355   :  { %v5352_v21 = vpop.f32.mrf.mxu0  ;;  %v3190_v47 = vadd.f32 %v3101_v59, %v5342_v26 }
 0x356   :  { %v5354_v60 = vpop.f32.mrf.mxu1  ;;  %v3192_v59 = vadd.f32 %v5352_v21, %v5346_v14 }
 0x357   :  { %v3145_v35 = vpop.f32.mrf.mxu0 }
 0x358   :  { %v4290_v52 = vpop.f32.mrf.mxu1 }
 0x359   :  { %v3146_v54 = vpop.f32.mrf.mxu0 }
 0x35a   :  { %v3185_v56 = vpop.f32.mrf.mxu1 }
 0x35b   :  { %v3275_v49 = vpop.f32.mrf.mxu0 }
 0x35c   :  { %v4291_v1 = vpop.f32.mrf.mxu1  ;;  %v3403_v17 = vadd.f32 %v3275_v49, %v3188_v46  ;;  %v4058_v49 = vpop.permute.xlu1 %4057 }
 0x35d   :  { %v3277_v63 = vpop.f32.mrf.mxu0 }
 0x35e   :  { %v3316_v37 = vpop.f32.mrf.mxu1  ;;  %v3404_v52 = vadd.f32 %v3277_v63, %v3189_v19 }
 0x35f   :  { %v3279_v2 = vpop.f32.mrf.mxu0  ;;  %v3405_v1 = vadd.f32 %v3316_v37, %v3190_v47 }
 0x360   :  { %v3318_v24 = vpop.f32.mrf.mxu1 }
 0x361   :  { %v3280_v0 = vpop.f32.mrf.mxu0 }
 0x362   :  { %v3319_v58 = vpop.f32.mrf.mxu1 }
 0x363   :  { %v3356_v3 = vpop.f32.mrf.mxu0 }
 0x364   :  { %v3320_v6 = vpop.f32.mrf.mxu1  ;;  %v3406_v63 = vadd.f32 %v3356_v3, %v3191_v27 }
 0x365   :  { %v5356_v9 = vpop.f32.mrf.mxu0 }
 0x366   :  { %v5358_v5 = vpop.f32.mrf.mxu1  ;;  %v3407_v11 = vadd.f32 %v5356_v9, %v3192_v59 }
 0x367   :  { %v3360_v32 = vpop.f32.mrf.mxu0 }
 0x368   :  { %v4296_v40 = vpop.f32.mrf.mxu1 }
 0x369   :  { %v3361_v25 = vpop.f32.mrf.mxu0 }
 0x36a   :  { %v3400_v4 = vpop.f32.mrf.mxu1 }
 0x36b   :  { %v3490_v39 = vpop.f32.mrf.mxu0 }
 0x36c   :  { %v4297_v51 = vpop.f32.mrf.mxu1  ;;  %v3618_v54 = vadd.f32 %v3490_v39, %v3403_v17  ;;  %v4070_v39 = vpop.permute.xlu0 %4069 }
 0x36d   :  { %v3492_v61 = vpop.f32.mrf.mxu0  ;;  %v3193_v51 = vadd.f32 %v5354_v60, %v5348_v43 }
 0x36e   :  { %v3531_v18 = vpop.f32.mrf.mxu1  ;;  %v3619_v24 = vadd.f32 %v3492_v61, %v3404_v52 }
 0x36f   :  { %v3494_v62 = vpop.f32.mrf.mxu0  ;;  %v3620_v6 = vadd.f32 %v3531_v18, %v3405_v1 }
 0x370   :  { %v3533_v22 = vpop.f32.mrf.mxu1 }
 0x371   :  { %v3495_v41 = vpop.f32.mrf.mxu0 }
 0x372   :  { %v3534_v55 = vpop.f32.mrf.mxu1 }
 0x373   :  { %v3571_v12 = vpop.f32.mrf.mxu0  ;;  %v3408_v55 = vadd.f32 %v5358_v5, %v3193_v51 }
 0x374   :  { %v3535_v7 = vpop.f32.mrf.mxu1  ;;  %v3621_v45 = vadd.f32 %v3571_v12, %v3406_v63 }
 0x375   :  { %v3573_v53 = vpop.f32.mrf.mxu0 }
 0x376   :  { %v3612_v28 = vpop.f32.mrf.mxu1  ;;  %v3622_v21 = vadd.f32 %v3573_v53, %v3407_v11 }
 0x377   :  { %v3575_v30 = vpop.f32.mrf.mxu0 }
 0x378   :  { %v4302_v36 = vpop.f32.mrf.mxu1 }
 0x379   :  { %v3576_v38 = vpop.f32.mrf.mxu0 }
 0x37a   :  { %v3615_v57 = vpop.f32.mrf.mxu1 }
 0x37b   :  { %v3705_v8 = vpop.f32.mrf.mxu0  ;;  %v3623_v57 = vadd.f32 %v3612_v28, %v3408_v55 }
 0x37c   :  { %v4303_v42 = vpop.f32.mrf.mxu1  ;;  %v3833_v0 = vadd.f32 %v3705_v8, %v3618_v54 }
 0x37d   :  { %v3707_v10 = vpop.f32.mrf.mxu0 }
 0x37e   :  { %v3746_v34 = vpop.f32.mrf.mxu1  ;;  %v3834_v20 = vadd.f32 %v3707_v10, %v3619_v24 }
 0x37f   :  { %v3709_v29 = vpop.f32.mrf.mxu0  ;;  %v3835_v40 = vadd.f32 %v3746_v34, %v3620_v6 }
 0x380   :  { %v3748_v31 = vpop.f32.mrf.mxu1 }
 0x381   :  { %v3710_v23 = vpop.f32.mrf.mxu0 }
 0x382   :  { %v3749_v44 = vpop.f32.mrf.mxu1 }
 0x383   :  { %v3786_v15 = vpop.f32.mrf.mxu0 }
 0x384   :  { %v3750_v48 = vpop.f32.mrf.mxu1  ;;  %v3836_v3 = vadd.f32 %v3786_v15, %v3621_v45 }
 0x385   :  { %v3788_v13 = vpop.f32.mrf.mxu0 }
 0x386   :  { %v3827_v33 = vpop.f32.mrf.mxu1  ;;  %v3837_v60 = vadd.f32 %v3788_v13, %v3622_v21 }
 0x387   :  { %v3790_v35 = vpop.f32.mrf.mxu0  ;;  %v3838_v10 = vadd.f32 %v3827_v33, %v3623_v57 }
 0x388   :  { %v4308_v56 = vpop.f32.mrf.mxu1 }
 0x389   :  { %v3791_v2 = vpop.f32.mrf.mxu0 }
 0x38a   :  { %v3830_v58 = vpop.f32.mrf.mxu1 }
 0x38b   :  { %v3920_v32 = vpop.f32.mrf.mxu0 }
 0x38c   :  { %v4048_v16 = vadd.f32 %v3920_v32, %v3833_v0  ;;  %v4309_v50 = vpop.f32.mrf.mxu1 }
 0x38d   :  { %v3922_v26 = vpop.f32.mrf.mxu0 }
 0x38e   :  { %v4060_v37 = vmul.f32 %v4058_v49, %v4048_v16  ;;  %v4049_v25 = vadd.f32 %v3922_v26, %v3834_v20  ;;  %v3961_v4 = vpop.f32.mrf.mxu1 }
 0x38f   :  { %v3924_v61 = vpop.f32.mrf.mxu0  ;;  %v4050_v18 = vadd.f32 %v3961_v4, %v3835_v40 }
 0x390   :  { %v4072_v62 = vadd.f32 %v4070_v39, %v4060_v37  ;;  %v4061_v22 = vmul.f32 %v4058_v49, %v4049_v25  ;;  %v3963_v41 = vpop.f32.mrf.mxu1 }
 0x391   :  { %v4062_v7 = vmul.f32 %v4058_v49, %v4050_v18  ;;  %v3925_v14 = vpop.f32.mrf.mxu0 }
 0x392   :  { %v4078_v30 = vmax.f32 %v4072_v62, 0.0  ;;  %v4073_v36 = vadd.f32 %v4070_v39, %v4061_v22  ;;  %v3964_v38 = vpop.f32.mrf.mxu1 }
 0x393   :  { %v4074_v8 = vadd.f32 %v4070_v39, %v4062_v7  ;;  %v4001_v43 = vpop.f32.mrf.mxu0 }
 0x394   :  { %4084 = vst [vmem:[#allocation2] sm:$0xff] %v4078_v30  ;;  %v4079_v42 = vmax.f32 %v4073_v36, 0.0  ;;  %v4051_v9 = vadd.f32 %v4001_v43, %v3836_v3  ;;  %v3965_v12 = vpop.f32.mrf.mxu1 }
 0x395   :  { %v4080_v34 = vmax.f32 %v4074_v8, 0.0  ;;  %v4003_v29 = vpop.f32.mrf.mxu0 }
 0x396   :  { %4085 = vst [vmem:[#allocation2 + $0x8] sm:$0xff] %v4079_v42  ;;  %v4063_v5 = vmul.f32 %v4058_v49, %v4051_v9  ;;  %v4052_v31 = vadd.f32 %v4003_v29, %v3837_v60  ;;  %v4042_v23 = vpop.f32.mrf.mxu1 }
 0x397   :  { %4086 = vst [vmem:[#allocation2 + $0x10] sm:$0xff] %v4080_v34  ;;  %v4053_v53 = vadd.f32 %v4042_v23, %v3838_v10  ;;  %v4005_v44 = vpop.f32.mrf.mxu0 }
 0x398   :  { %v4075_v15 = vadd.f32 %v4070_v39, %v4063_v5  ;;  %v4064_v46 = vmul.f32 %v4058_v49, %v4052_v31  ;;  %v4314_v28 = vpop.f32.mrf.mxu1 }
 0x399   :  { %v4065_v48 = vmul.f32 %v4058_v49, %v4053_v53  ;;  %v4006_v19 = vpop.f32.mrf.mxu0 }
 0x39a   :  { %v4081_v13 = vmax.f32 %v4075_v15, 0.0  ;;  %v4076_v17 = vadd.f32 %v4070_v39, %v4064_v46  ;;  %v4045_v47 = vpop.f32.mrf.mxu1 }
 0x39b   :  { %v4077_v33 = vadd.f32 %v4070_v39, %v4065_v48 }
 0x39c   :  { %4089 = vst [vmem:[#allocation2 + $0x20] sm:$0xff] %v4081_v13  ;;  %v4082_v35 = vmax.f32 %v4076_v17, 0.0  ;;  %v4315_v52 = vpop.f32.mrf.mxu1 }
 0x39d   :  { %v4083_v54 = vmax.f32 %v4077_v33, 0.0 }
 0x39e   :  { %4090 = vst [vmem:[#allocation2 + $0x28] sm:$0xff] %v4082_v35 }
 0x39f   :  { %4091 = vst [vmem:[#allocation2 + $0x30] sm:$0xff] %v4083_v54 }
 0x3a0   :  { %4347 = shalt.err (!%p4344_p4)
}
 0x3a1   :  { %s4370_s22 = smov 512   ;;  %s4371_s23 = smov 32  }
 0x3a2   :  { %4104 = dma.vmem_to_hbm [thread:$0]  %s4099_s20, 1024, %s5382_s8, [#allocation3], %s4370_s22, %s4370_s22, %s4371_s23  }
 0x3a3   :  { %4356 = dma.done.wait [#allocation3], 1024  }
 0x3a4   :  { %4357 = vsyncadd [#allocation3], 4294966272 }
 0x3a5   :  { %4108 = vsyncpa [#allocation3], 1 }

</bundles_post_ra>
